<compile_context>
chip_gen: v5e
topology: v5e:2x2
jax: 0.10.0
libtpu: 0.0.40
codegen_flags: <defaults>
</compile_context>

<pallas_src>
import functools
import math

import jax
import jax.numpy as jnp
from jax.experimental import pallas as pl
from jax.experimental.pallas import tpu as pltpu


# ----------------------------- kernels --------------------------------------

def _layernorm(x, g, b, eps=1e-5):
    mean = jnp.mean(x, axis=-1, keepdims=True)
    var = jnp.mean((x - mean) ** 2, axis=-1, keepdims=True)
    return (x - mean) * jax.lax.rsqrt(var + eps) * g + b


def gpt_blocks_kernel(n_heads, q_tile,
                      x_in_ref,
                      ln1_g_ref, ln1_b_ref, wqkv_ref, wproj_ref, bproj_ref,
                      ln2_g_ref, ln2_b_ref, wff1_ref, bff1_ref, wff2_ref,
                      bff2_ref, lnf_g_ref, lnf_b_ref,
                      xn_ref,           # out: (1, T, C) bf16 = ln_f(x), last layer
                      x_ref):           # scratch: (1, T, C) f32 resident residual
    """One grid step == (one batch row, one layer); x_ref carries the stream."""
    layer = pl.program_id(1)
    last_layer = pl.num_programs(1) - 1

    @pl.when(layer == 0)
    def _():
        x_ref[...] = x_in_ref[...]

    x = x_ref[...]                                   # (1, T, C) f32
    _, T, C = x.shape
    H = n_heads
    d_k = C // H
    n_tiles = T // q_tile

    # ---- LN1 + QKV over the full sequence (K/V feed every query tile).
    #      1/sqrt(d_k) is already folded into the Q weight columns. ----
    h = _layernorm(x, ln1_g_ref[...], ln1_b_ref[...])
    qkv = jnp.einsum('btc,cd->btd', h.astype(jnp.bfloat16), wqkv_ref[...],
                     preferred_element_type=jnp.float32)          # (1, T, 3C)

    def split_heads(a):
        # (1, T, C) head-major columns -> (H, T, d_k) bf16 for the MXU.
        # TODO(synk): a reshape->(T,H,d_k) + multi-batch-dim einsum would avoid
        # the H lane-shifted slices, but Mosaic dot_general only supports a
        # single leading batch dim, so the head-batched operand is built once
        # per layer here.
        return jnp.concatenate(
            [a[:, :, i * d_k:(i + 1) * d_k] for i in range(H)],
            axis=0).astype(jnp.bfloat16)

    qh = split_heads(qkv[:, :, :C])                  # (H, T, d_k)
    kh = split_heads(qkv[:, :, C:2 * C])
    vh = split_heads(qkv[:, :, 2 * C:])

    row = jax.lax.broadcasted_iota(jnp.int32, (q_tile, q_tile), 0)
    col = jax.lax.broadcasted_iota(jnp.int32, (q_tile, q_tile), 1)
    diag_mask = (col <= row)[None]                   # (1, TQ, TK)

    # ---- per-query-row-tile attention (online softmax) + feed-forward ----
    for it in range(n_tiles):
        r0 = it * q_tile
        q_t = qh[:, r0:r0 + q_tile, :]               # (H, TQ, d_k) bf16

        m_i = l_i = acc = None
        for jt in range(it + 1):                     # causal: only KV tiles <= it
            c0 = jt * q_tile
            k_t = kh[:, c0:c0 + q_tile, :]
            v_t = vh[:, c0:c0 + q_tile, :]
            s = jnp.einsum('hqd,hkd->hqk', q_t, k_t,
                           preferred_element_type=jnp.float32)    # (H, TQ, TK)
            if jt == it:                             # diagonal tile: causal mask
                s = jnp.where(diag_mask, s, -1e9)
            m_t = jnp.max(s, axis=-1, keepdims=True)
            if jt == 0:
                m_i = m_t
                p = jnp.exp(s - m_i)
                l_i = jnp.sum(p, axis=-1, keepdims=True)
                acc = jnp.einsum('hqk,hkd->hqd', p.astype(jnp.bfloat16), v_t,
                                 preferred_element_type=jnp.float32)
            else:
                m_new = jnp.maximum(m_i, m_t)
                alpha = jnp.exp(m_i - m_new)
                p = jnp.exp(s - m_new)
                l_i = alpha * l_i + jnp.sum(p, axis=-1, keepdims=True)
                acc = alpha * acc + jnp.einsum(
                    'hqk,hkd->hqd', p.astype(jnp.bfloat16), v_t,
                    preferred_element_type=jnp.float32)
                m_i = m_new

        # Normalize AFTER the PV matmul: d_k-wide multiply instead of T-wide.
        ctx = acc * pl.reciprocal(l_i, approx=True)   # (H, TQ, d_k) f32
        # Merge heads back to (1, TQ, C), head-major — matches PyTorch's
        # (attn @ v).permute(0,2,1,3).view(B,T,C) layout expected by proj.
        ctx = jnp.concatenate([ctx[i:i + 1] for i in range(H)], axis=-1)

        attn_out = jnp.einsum('btc,cd->btd', ctx.astype(jnp.bfloat16),
                              wproj_ref[...],
                              preferred_element_type=jnp.float32) + bproj_ref[...]
        x_t = x[:, r0:r0 + q_tile, :] + attn_out      # (1, TQ, C) f32

        # ---- feed-forward over the same query rows ----
        h2 = _layernorm(x_t, ln2_g_ref[...], ln2_b_ref[...])
        ff = jnp.einsum('btc,cf->btf', h2.astype(jnp.bfloat16), wff1_ref[...],
                        preferred_element_type=jnp.float32) + bff1_ref[...]
        ff = jnp.maximum(ff, 0.0)
        x_t = x_t + jnp.einsum('btf,fc->btc', ff.astype(jnp.bfloat16),
                               wff2_ref[...],
                               preferred_element_type=jnp.float32) + bff2_ref[...]

        x_ref[:, r0:r0 + q_tile, :] = x_t

        # Final LayerNorm hoisted out of the LM-head kernel: emit bf16 ln_f(x)
        # once, on the last layer only.
        @pl.when(layer == last_layer)
        def _(x_t=x_t, r0=r0):
            xn = _layernorm(x_t, lnf_g_ref[...], lnf_b_ref[...])
            xn_ref[:, r0:r0 + q_tile, :] = xn.astype(xn_ref.dtype)


def lm_head_kernel(xn_ref, whead_ref, out_ref):
    """Pure bf16 matmul: one (row-tile x vocab-tile) block of the logits."""
    out_ref[...] = jnp.dot(xn_ref[...], whead_ref[...],
                           preferred_element_type=jnp.float32)


# ----------------------------- wrappers -------------------------------------

def _pick_tile(n, candidates):
    for c in candidates:
        if n % c == 0:
            return c
    return n


def _layer_spec(tail_shape):
    """BlockSpec selecting layer l's slab; leading layer dim squeezed."""
    nd = len(tail_shape)
    return pl.BlockSpec((None,) + tuple(tail_shape),
                        lambda b, l, nd=nd: (l,) + (0,) * nd)


def run_blocks(x, packed, n_heads):
    B, T, C = x.shape
    L = packed['wqkv'].shape[0]
    F = packed['wff1'].shape[-1]
    q_tile = _pick_tile(T, (256, 128, 64, 32, 16, 8))

    in_specs = [
        # NOTE: x_in is only read at layer 0; pl.Buffered(1) would free one
        # activation-sized buffer (left at the default double-buffering here).
        pl.BlockSpec((1, T, C), lambda b, l: (b, 0, 0)),   # x_in (per batch row)
        _layer_spec((1, C)), _layer_spec((1, C)),          # ln1 g, b
        _layer_spec((C, 3 * C)),                           # wqkv (bf16, Q scaled)
        _layer_spec((C, C)), _layer_spec((1, C)),          # wproj (bf16), bproj
        _layer_spec((1, C)), _layer_spec((1, C)),          # ln2 g, b
        _layer_spec((C, F)), _layer_spec((1, F)),          # wff1 (bf16), bff1
        _layer_spec((F, C)), _layer_spec((1, C)),          # wff2 (bf16), bff2
        pl.BlockSpec((1, C), lambda b, l: (0, 0)),         # ln_f g
        pl.BlockSpec((1, C), lambda b, l: (0, 0)),         # ln_f b
    ]
    out_specs = pl.BlockSpec((1, T, C), lambda b, l: (b, 0, 0))

    # Explicit VMEM budget: double-buffered weight slab + resident activation
    # + tiled intermediates (clamped to [32 MiB, 64 MiB]: valid on v5e/v6e/v7x).
    wbytes = (C * 3 * C + C * C + 2 * C * F) * 2 + (6 * C + F + C) * 4
    abytes = T * C * (4 + 4 + 2) * 2
    ibytes = (T * 3 * C * 4 + 3 * T * C * 2
              + 2 * n_heads * q_tile * q_tile * 4 + q_tile * F * 4)
    vmem_limit = int(min(64 << 20,
                         max(32 << 20, 2 * wbytes + abytes + ibytes + (4 << 20))))

    return pl.pallas_call(
        functools.partial(gpt_blocks_kernel, n_heads, q_tile),
        out_shape=jax.ShapeDtypeStruct((B, T, C), jnp.bfloat16),
        grid=(B, L),
        in_specs=in_specs,
        out_specs=out_specs,
        scratch_shapes=[pltpu.VMEM((1, T, C), jnp.float32)],
        compiler_params=pltpu.CompilerParams(
            dimension_semantics=("parallel", "arbitrary"),
            vmem_limit_bytes=vmem_limit),
    )(x,
      packed['ln1_g'], packed['ln1_b'], packed['wqkv'], packed['wproj'],
      packed['bproj'], packed['ln2_g'], packed['ln2_b'], packed['wff1'],
      packed['bff1'], packed['wff2'], packed['bff2'],
      packed['lnf_g'], packed['lnf_b'])


def run_head(xn, whead_bf16):
    B, T, C = xn.shape
    Vp = whead_bf16.shape[1]
    R = B * T
    xn2 = xn.reshape(R, C)                     # free layout change outside kernel
    tile_r = _pick_tile(R, (512, 256, 128, 64, 32, 16, 8))
    tile_v = _pick_tile(Vp, (2048, 1024, 512, 256, 128))

    vmem_limit = int(min(64 << 20,
                         max(32 << 20,
                             2 * (tile_r * C * 2 + C * tile_v * 2
                                  + tile_r * tile_v * 4) + (4 << 20))))

    out = pl.pallas_call(
        lm_head_kernel,
        out_shape=jax.ShapeDtypeStruct((R, Vp), jnp.float32),
        grid=(R // tile_r, Vp // tile_v),
        in_specs=[
            pl.BlockSpec((tile_r, C), lambda i, j: (i, 0)),
            pl.BlockSpec((C, tile_v), lambda i, j: (0, j)),
        ],
        out_specs=pl.BlockSpec((tile_r, tile_v), lambda i, j: (i, j)),
        compiler_params=pltpu.CompilerParams(
            dimension_semantics=("parallel", "parallel"),
            vmem_limit_bytes=vmem_limit),
    )(xn2, whead_bf16)
    return out.reshape(B, T, Vp)


# ----------------------------- model setup ----------------------------------

def sinusoidal_pos_enc(block_size, d_model):
    pos = jnp.arange(block_size, dtype=jnp.float32)[:, None]
    div = jnp.exp(jnp.arange(0, d_model, 2, dtype=jnp.float32)
                  * (-math.log(10000.0) / d_model))
    pe = jnp.zeros((block_size, d_model), jnp.float32)
    pe = pe.at[:, 0::2].set(jnp.sin(pos * div))
    pe = pe.at[:, 1::2].set(jnp.cos(pos * div))
    return pe


def init_params(key, vocab_size, d_model, n_heads, d_ff, n_layers, block_size):
    """Parameters in PyTorch-equivalent layout (weights pre-transposed so
    y = x @ W + b).  qkv has no bias, head has no bias (matches the module)."""
    def normal(k, shape, scale=0.02):
        return scale * jax.random.normal(k, shape, dtype=jnp.float32)

    keys = jax.random.split(key, 2 + 6 * n_layers)
    params = {
        'tok_emb': normal(keys[0], (vocab_size, d_model)),
        'pos_enc': sinusoidal_pos_enc(block_size, d_model),
        'whead_t': normal(keys[1], (d_model, vocab_size)),
        'lnf_g': jnp.ones((1, d_model), jnp.float32),
        'lnf_b': jnp.zeros((1, d_model), jnp.float32),
        'blocks': [],
    }
    for l in range(n_layers):
        k = keys[2 + 6 * l: 2 + 6 * (l + 1)]
        params['blocks'].append({
            'ln1_g': jnp.ones((1, d_model), jnp.float32),
            'ln1_b': jnp.zeros((1, d_model), jnp.float32),
            'wqkv_t': normal(k[0], (d_model, 3 * d_model)),
            'wproj_t': normal(k[1], (d_model, d_model)),
            'bproj': normal(k[2], (1, d_model)),
            'ln2_g': jnp.ones((1, d_model), jnp.float32),
            'ln2_b': jnp.zeros((1, d_model), jnp.float32),
            'wff1_t': normal(k[3], (d_model, d_ff)),
            'bff1': normal(k[4], (1, d_ff)),
            'wff2_t': normal(k[5], (d_ff, d_model)),
            'bff2': jnp.zeros((1, d_model), jnp.float32),
        })
    return params


def _qkv_contiguous_perm(d_model, n_heads):
    """PyTorch's forward views the qkv output as (B,T,H,3*d_k) and chunk(3,-1)s
    it, i.e. the output columns are per-head interleaved [q_h|k_h|v_h] blocks.
    This permutation maps that layout to contiguous [Q | K | V] (head-major
    inside each third) so the kernel slices are lane-contiguous."""
    d_k = d_model // n_heads
    idx = []
    for which in range(3):            # 0: Q, 1: K, 2: V
        for h in range(n_heads):
            base = h * 3 * d_k + which * d_k
            idx.extend(range(base, base + d_k))
    return jnp.asarray(idx, dtype=jnp.int32)


def pack_params(params, n_heads):
    """Kernel layout: contiguous-QKV columns with 1/sqrt(d_k) folded into the Q
    columns, per-layer weights stacked along a leading layer axis, matmul
    weights in bf16 (f32 accumulation), LM-head vocab padded to a multiple of
    128 for lane-dense tiles."""
    vocab_size, d_model = params['tok_emb'].shape
    d_k = d_model // n_heads
    perm = _qkv_contiguous_perm(d_model, n_heads)
    bl = params['blocks']
    stack = lambda name: jnp.stack([b[name] for b in bl], axis=0)

    def pack_qkv(w):
        w = w[:, perm]
        return w.at[:, :d_model].multiply(d_k ** -0.5)   # fold attention scale

    vp = ((vocab_size + 127) // 128) * 128
    whead = jnp.pad(params['whead_t'], ((0, 0), (0, vp - vocab_size)))

    return {
        'tok_emb': params['tok_emb'],
        'pos_enc': params['pos_enc'],
        'lnf_g': params['lnf_g'],
        'lnf_b': params['lnf_b'],
        'whead': whead.astype(jnp.bfloat16),
        'ln1_g': stack('ln1_g'), 'ln1_b': stack('ln1_b'),
        'wqkv': jnp.stack([pack_qkv(b['wqkv_t']) for b in bl],
                          axis=0).astype(jnp.bfloat16),
        'wproj': stack('wproj_t').astype(jnp.bfloat16),
        'bproj': stack('bproj'),
        'ln2_g': stack('ln2_g'), 'ln2_b': stack('ln2_b'),
        'wff1': stack('wff1_t').astype(jnp.bfloat16), 'bff1': stack('bff1'),
        'wff2': stack('wff2_t').astype(jnp.bfloat16), 'bff2': stack('bff2'),
    }


def gpt_forward(idx, packed, n_heads):
    B, T = idx.shape
    V = packed['tok_emb'].shape[0]
    # Embedding gather + positional encoding (thin JAX glue outside the kernels).
    x = jnp.take(packed['tok_emb'], idx, axis=0) + packed['pos_enc'][:T][None]
    xn = run_blocks(x, packed, n_heads)            # (B, T, C) bf16 == ln_f(x)
    logits = run_head(xn, packed['whead'])         # (B, T, Vp) f32
    return logits[:, :, :V]


# ----------------------------- main ------------------------------------------

if __name__ == "__main__":
    vocab_size, d_model, n_heads, d_ff, n_layers, block_size = 64, 32, 4, 64, 2, 16
    B, T = 2, 8

    key = jax.random.PRNGKey(0)
    k_params, k_idx = jax.random.split(key)
    params = init_params(k_params, vocab_size, d_model, n_heads, d_ff,
                         n_layers, block_size)
    packed = pack_params(params, n_heads)
    idx = jax.random.randint(k_idx, (B, T), 0, vocab_size, dtype=jnp.int32)

    logits = gpt_forward(idx, packed, n_heads)
    jax.block_until_ready(logits)
    assert logits.shape == (B, T, vocab_size)
    print("KERNEL_OK")
</pallas_src>

<mosaic_0001>
module attributes {stable_mosaic.version = 11 : i64} {
  func.func @gpt_blocks_kernel(%arg0: i32, %arg1: i32, %arg2: memref<1x8x32xf32, #tpu.memory_space<vmem>>, %arg3: memref<1x1x32xf32, #tpu.memory_space<vmem>>, %arg4: memref<1x1x32xf32, #tpu.memory_space<vmem>>, %arg5: memref<1x32x96xbf16, #tpu.memory_space<vmem>>, %arg6: memref<1x32x32xbf16, #tpu.memory_space<vmem>>, %arg7: memref<1x1x32xf32, #tpu.memory_space<vmem>>, %arg8: memref<1x1x32xf32, #tpu.memory_space<vmem>>, %arg9: memref<1x1x32xf32, #tpu.memory_space<vmem>>, %arg10: memref<1x32x64xbf16, #tpu.memory_space<vmem>>, %arg11: memref<1x1x64xf32, #tpu.memory_space<vmem>>, %arg12: memref<1x64x32xbf16, #tpu.memory_space<vmem>>, %arg13: memref<1x1x32xf32, #tpu.memory_space<vmem>>, %arg14: memref<1x32xf32, #tpu.memory_space<vmem>>, %arg15: memref<1x32xf32, #tpu.memory_space<vmem>>, %arg16: memref<1x8x32xbf16, #tpu.memory_space<vmem>>, %arg17: memref<1x8x32xf32, #tpu.memory_space<vmem>>) attributes {dimension_semantics = [#tpu.dimension_semantics<parallel>, #tpu.dimension_semantics<arbitrary>], iteration_bounds = array<i64: 2, 2>, scalar_prefetch = 0 : i64, scratch_operands = 1 : i64, tpu.core_type = #tpu.core_type<tc>, window_params = [{transform_indices = @transform_0, window_bounds = array<i64: 1, 8, 32>}, {transform_indices = @transform_1, window_bounds = array<i64: 1, 1, 32>}, {transform_indices = @transform_2, window_bounds = array<i64: 1, 1, 32>}, {transform_indices = @transform_3, window_bounds = array<i64: 1, 32, 96>}, {transform_indices = @transform_4, window_bounds = array<i64: 1, 32, 32>}, {transform_indices = @transform_5, window_bounds = array<i64: 1, 1, 32>}, {transform_indices = @transform_6, window_bounds = array<i64: 1, 1, 32>}, {transform_indices = @transform_7, window_bounds = array<i64: 1, 1, 32>}, {transform_indices = @transform_8, window_bounds = array<i64: 1, 32, 64>}, {transform_indices = @transform_9, window_bounds = array<i64: 1, 1, 64>}, {transform_indices = @transform_10, window_bounds = array<i64: 1, 64, 32>}, {transform_indices = @transform_11, window_bounds = array<i64: 1, 1, 32>}, {pipeline_mode = #tpu.pipeline_mode<synchronous>, transform_indices = @transform_12, window_bounds = array<i64: 1, 32>}, {pipeline_mode = #tpu.pipeline_mode<synchronous>, transform_indices = @transform_13, window_bounds = array<i64: 1, 32>}, {transform_indices = @transform_14, window_bounds = array<i64: 1, 8, 32>}]} {
    %c0_i32 = arith.constant 0 : i32
    %0 = arith.cmpi eq, %arg1, %c0_i32 : i32
    %1 = arith.extui %0 : i1 to i32
    %c0_i32_0 = arith.constant 0 : i32
    %2 = arith.cmpi ne, %1, %c0_i32_0 : i32
    scf.if %2 {
      %c0_59 = arith.constant 0 : index
      %c0_60 = arith.constant 0 : index
      %c0_61 = arith.constant 0 : index
      %146 = vector.load %arg2[%c0_59, %c0_60, %c0_61] : memref<1x8x32xf32, #tpu.memory_space<vmem>>, vector<1x8x32xf32>
      %c0_62 = arith.constant 0 : index
      %c0_63 = arith.constant 0 : index
      %c0_64 = arith.constant 0 : index
      %147 = vector.load %arg17[%c0_62, %c0_63, %c0_64] : memref<1x8x32xf32, #tpu.memory_space<vmem>>, vector<1x8x32xf32>
      tpu.vector_store %arg17[%c0_62, %c0_63, %c0_64], %146 {strides = array<i32>} : memref<1x8x32xf32, #tpu.memory_space<vmem>>, vector<1x8x32xf32>,
    } else {
    }
    %c0 = arith.constant 0 : index
    %c0_1 = arith.constant 0 : index
    %c0_2 = arith.constant 0 : index
    %3 = vector.load %arg17[%c0, %c0_1, %c0_2] : memref<1x8x32xf32, #tpu.memory_space<vmem>>, vector<1x8x32xf32>
    %c0_3 = arith.constant 0 : index
    %c0_4 = arith.constant 0 : index
    %c0_5 = arith.constant 0 : index
    %4 = vector.load %arg3[%c0_3, %c0_4, %c0_5] : memref<1x1x32xf32, #tpu.memory_space<vmem>>, vector<1x1x32xf32>
    %5 = vector.shape_cast %4 : vector<1x1x32xf32> to vector<1x32xf32>
    %c0_6 = arith.constant 0 : index
    %c0_7 = arith.constant 0 : index
    %c0_8 = arith.constant 0 : index
    %6 = vector.load %arg4[%c0_6, %c0_7, %c0_8] : memref<1x1x32xf32, #tpu.memory_space<vmem>>, vector<1x1x32xf32>
    %7 = vector.shape_cast %6 : vector<1x1x32xf32> to vector<1x32xf32>
    %cst = arith.constant dense<0.000000e+00> : vector<1x8xf32>
    %8 = vector.multi_reduction <add>, %3, %cst [2] : vector<1x8x32xf32> to vector<1x8xf32>
    %9 = vector.shape_cast %8 : vector<1x8xf32> to vector<1x8x1xf32>
    %cst_9 = arith.constant 3.200000e+01 : f32
    %10 = vector.broadcast %cst_9 : f32 to vector<1x8x1xf32>
    %11 = arith.divf %9, %10 : vector<1x8x1xf32>
    %12 = vector.broadcast %11 : vector<1x8x1xf32> to vector<1x8x32xf32>
    %13 = arith.subf %3, %12 : vector<1x8x32xf32>
    %14 = arith.mulf %13, %13 : vector<1x8x32xf32>
    %cst_10 = arith.constant dense<0.000000e+00> : vector<1x8xf32>
    %15 = vector.multi_reduction <add>, %14, %cst_10 [2] : vector<1x8x32xf32> to vector<1x8xf32>
    %16 = vector.shape_cast %15 : vector<1x8xf32> to vector<1x8x1xf32>
    %cst_11 = arith.constant 3.200000e+01 : f32
    %17 = vector.broadcast %cst_11 : f32 to vector<1x8x1xf32>
    %18 = arith.divf %16, %17 : vector<1x8x1xf32>
    %19 = vector.broadcast %11 : vector<1x8x1xf32> to vector<1x8x32xf32>
    %20 = arith.subf %3, %19 : vector<1x8x32xf32>
    %cst_12 = arith.constant 9.99999974E-6 : f32
    %21 = vector.broadcast %cst_12 : f32 to vector<1x8x1xf32>
    %22 = arith.addf %18, %21 : vector<1x8x1xf32>
    %23 = math.rsqrt %22 : vector<1x8x1xf32>
    %24 = vector.broadcast %23 : vector<1x8x1xf32> to vector<1x8x32xf32>
    %25 = arith.mulf %20, %24 : vector<1x8x32xf32>
    %26 = vector.shape_cast %5 : vector<1x32xf32> to vector<1x1x32xf32>
    %27 = vector.broadcast %26 : vector<1x1x32xf32> to vector<1x8x32xf32>
    %28 = arith.mulf %25, %27 : vector<1x8x32xf32>
    %29 = vector.shape_cast %7 : vector<1x32xf32> to vector<1x1x32xf32>
    %30 = vector.broadcast %29 : vector<1x1x32xf32> to vector<1x8x32xf32>
    %31 = arith.addf %28, %30 : vector<1x8x32xf32>
    %32 = arith.truncf %31 : vector<1x8x32xf32> to vector<1x8x32xbf16>
    %c0_13 = arith.constant 0 : index
    %c0_14 = arith.constant 0 : index
    %c0_15 = arith.constant 0 : index
    %33 = vector.load %arg5[%c0_13, %c0_14, %c0_15] : memref<1x32x96xbf16, #tpu.memory_space<vmem>>, vector<1x32x96xbf16>
    %34 = vector.shape_cast %33 : vector<1x32x96xbf16> to vector<32x96xbf16>
    "tpu.trace_start"() <{level = 10 : i32, message = "btc,cd->btd"}> : () -> ()
    %cst_16 = arith.constant dense<0.000000e+00> : vector<1x8x96xf32>
    %35 = tpu.matmul %32, %34, %cst_16 {dimension_numbers = #tpu.dot_dimension_numbers<[2], [0], [0, 1], [1], [0, 0, 0, 1, 1, 1], [], []>} : vector<1x8x32xbf16>, vector<32x96xbf16>, vector<1x8x96xf32> -> vector<1x8x96xf32>
    "tpu.trace_stop"() : () -> ()
    %36 = vector.extract_strided_slice %35 {offsets = [0, 0, 0], sizes = [1, 8, 32], strides = [1, 1, 1]} : vector<1x8x96xf32> to vector<1x8x32xf32>
    %37 = vector.extract_strided_slice %36 {offsets = [0, 0, 0], sizes = [1, 8, 8], strides = [1, 1, 1]} : vector<1x8x32xf32> to vector<1x8x8xf32>
    %38 = vector.extract_strided_slice %36 {offsets = [0, 0, 8], sizes = [1, 8, 8], strides = [1, 1, 1]} : vector<1x8x32xf32> to vector<1x8x8xf32>
    %39 = vector.extract_strided_slice %36 {offsets = [0, 0, 16], sizes = [1, 8, 8], strides = [1, 1, 1]} : vector<1x8x32xf32> to vector<1x8x8xf32>
    %40 = vector.extract_strided_slice %36 {offsets = [0, 0, 24], sizes = [1, 8, 8], strides = [1, 1, 1]} : vector<1x8x32xf32> to vector<1x8x8xf32>
    %41 = tpu.concatenate %37, %38, %39, %40 in 0 : vector<1x8x8xf32>, vector<1x8x8xf32>, vector<1x8x8xf32>, vector<1x8x8xf32> -> vector<4x8x8xf32>
    %42 = arith.truncf %41 : vector<4x8x8xf32> to vector<4x8x8xbf16>
    %43 = vector.extract_strided_slice %35 {offsets = [0, 0, 32], sizes = [1, 8, 32], strides = [1, 1, 1]} : vector<1x8x96xf32> to vector<1x8x32xf32>
    %44 = vector.extract_strided_slice %43 {offsets = [0, 0, 0], sizes = [1, 8, 8], strides = [1, 1, 1]} : vector<1x8x32xf32> to vector<1x8x8xf32>
    %45 = vector.extract_strided_slice %43 {offsets = [0, 0, 8], sizes = [1, 8, 8], strides = [1, 1, 1]} : vector<1x8x32xf32> to vector<1x8x8xf32>
    %46 = vector.extract_strided_slice %43 {offsets = [0, 0, 16], sizes = [1, 8, 8], strides = [1, 1, 1]} : vector<1x8x32xf32> to vector<1x8x8xf32>
    %47 = vector.extract_strided_slice %43 {offsets = [0, 0, 24], sizes = [1, 8, 8], strides = [1, 1, 1]} : vector<1x8x32xf32> to vector<1x8x8xf32>
    %48 = tpu.concatenate %44, %45, %46, %47 in 0 : vector<1x8x8xf32>, vector<1x8x8xf32>, vector<1x8x8xf32>, vector<1x8x8xf32> -> vector<4x8x8xf32>
    %49 = arith.truncf %48 : vector<4x8x8xf32> to vector<4x8x8xbf16>
    %50 = vector.extract_strided_slice %35 {offsets = [0, 0, 64], sizes = [1, 8, 32], strides = [1, 1, 1]} : vector<1x8x96xf32> to vector<1x8x32xf32>
    %51 = vector.extract_strided_slice %50 {offsets = [0, 0, 0], sizes = [1, 8, 8], strides = [1, 1, 1]} : vector<1x8x32xf32> to vector<1x8x8xf32>
    %52 = vector.extract_strided_slice %50 {offsets = [0, 0, 8], sizes = [1, 8, 8], strides = [1, 1, 1]} : vector<1x8x32xf32> to vector<1x8x8xf32>
    %53 = vector.extract_strided_slice %50 {offsets = [0, 0, 16], sizes = [1, 8, 8], strides = [1, 1, 1]} : vector<1x8x32xf32> to vector<1x8x8xf32>
    %54 = vector.extract_strided_slice %50 {offsets = [0, 0, 24], sizes = [1, 8, 8], strides = [1, 1, 1]} : vector<1x8x32xf32> to vector<1x8x8xf32>
    %55 = tpu.concatenate %51, %52, %53, %54 in 0 : vector<1x8x8xf32>, vector<1x8x8xf32>, vector<1x8x8xf32>, vector<1x8x8xf32> -> vector<4x8x8xf32>
    %56 = arith.truncf %55 : vector<4x8x8xf32> to vector<4x8x8xbf16>
    %57 = tpu.iota {dimensions = array<i32: 0>} : vector<8x8xi32>
    %58 = tpu.iota {dimensions = array<i32: 1>} : vector<8x8xi32>
    %59 = arith.cmpi sle, %58, %57 : vector<8x8xi32>
    %60 = vector.shape_cast %59 : vector<8x8xi1> to vector<1x8x8xi1>
    "tpu.trace_start"() <{level = 10 : i32, message = "hqd,hkd->hqk"}> : () -> ()
    %cst_17 = arith.constant dense<0.000000e+00> : vector<4x8x8xf32>
    %61 = tpu.matmul %42, %49, %cst_17 {dimension_numbers = #tpu.dot_dimension_numbers<[2], [2], [1], [1], [0, 0, 0, 1, 1, 1], [0], [0]>} : vector<4x8x8xbf16>, vector<4x8x8xbf16>, vector<4x8x8xf32> -> vector<4x8x8xf32>
    %cst_18 = arith.constant -1.000000e+09 : f32
    "tpu.trace_stop"() : () -> ()
    %62 = vector.shape_cast %60 : vector<1x8x8xi1> to vector<1x8x8xi1>
    %63 = vector.broadcast %62 : vector<1x8x8xi1> to vector<4x8x8xi1>
    %64 = vector.broadcast %cst_18 : f32 to vector<4x8x8xf32>
    %65 = arith.select %63, %61, %64 : vector<4x8x8xi1>, vector<4x8x8xf32>
    %cst_19 = arith.constant dense<0xFF800000> : vector<4x8xf32>
    %66 = vector.multi_reduction <maximumf>, %65, %cst_19 [2] : vector<4x8x8xf32> to vector<4x8xf32>
    %67 = vector.shape_cast %66 : vector<4x8xf32> to vector<4x8x1xf32>
    %68 = vector.broadcast %67 : vector<4x8x1xf32> to vector<4x8x8xf32>
    %69 = arith.subf %65, %68 : vector<4x8x8xf32>
    %70 = math.exp %69 : vector<4x8x8xf32>
    %cst_20 = arith.constant dense<0.000000e+00> : vector<4x8xf32>
    %71 = vector.multi_reduction <add>, %70, %cst_20 [2] : vector<4x8x8xf32> to vector<4x8xf32>
    %72 = vector.shape_cast %71 : vector<4x8xf32> to vector<4x8x1xf32>
    %73 = arith.truncf %70 : vector<4x8x8xf32> to vector<4x8x8xbf16>
    "tpu.trace_start"() <{level = 10 : i32, message = "hqk,hkd->hqd"}> : () -> ()
    %cst_21 = arith.constant dense<0.000000e+00> : vector<4x8x8xf32>
    %74 = tpu.matmul %73, %56, %cst_21 {dimension_numbers = #tpu.dot_dimension_numbers<[2], [1], [1], [2], [0, 0, 0, 1, 1, 2], [0], [0]>} : vector<4x8x8xbf16>, vector<4x8x8xbf16>, vector<4x8x8xf32> -> vector<4x8x8xf32>
    "tpu.trace_stop"() : () -> ()
    %75 = tpu.reciprocal %72 {approx = true} : vector<4x8x1xf32> -> vector<4x8x1xf32>
    %76 = vector.broadcast %75 : vector<4x8x1xf32> to vector<4x8x8xf32>
    %77 = arith.mulf %74, %76 : vector<4x8x8xf32>
    %78 = vector.extract_strided_slice %77 {offsets = [0, 0, 0], sizes = [1, 8, 8], strides = [1, 1, 1]} : vector<4x8x8xf32> to vector<1x8x8xf32>
    %79 = vector.extract_strided_slice %77 {offsets = [1, 0, 0], sizes = [1, 8, 8], strides = [1, 1, 1]} : vector<4x8x8xf32> to vector<1x8x8xf32>
    %80 = vector.extract_strided_slice %77 {offsets = [2, 0, 0], sizes = [1, 8, 8], strides = [1, 1, 1]} : vector<4x8x8xf32> to vector<1x8x8xf32>
    %81 = vector.extract_strided_slice %77 {offsets = [3, 0, 0], sizes = [1, 8, 8], strides = [1, 1, 1]} : vector<4x8x8xf32> to vector<1x8x8xf32>
    %82 = tpu.concatenate %78, %79, %80, %81 in 2 : vector<1x8x8xf32>, vector<1x8x8xf32>, vector<1x8x8xf32>, vector<1x8x8xf32> -> vector<1x8x32xf32>
    %83 = arith.truncf %82 : vector<1x8x32xf32> to vector<1x8x32xbf16>
    %c0_22 = arith.constant 0 : index
    %c0_23 = arith.constant 0 : index
    %c0_24 = arith.constant 0 : index
    %84 = vector.load %arg6[%c0_22, %c0_23, %c0_24] : memref<1x32x32xbf16, #tpu.memory_space<vmem>>, vector<1x32x32xbf16>
    %85 = vector.shape_cast %84 : vector<1x32x32xbf16> to vector<32x32xbf16>
    "tpu.trace_start"() <{level = 10 : i32, message = "btc,cd->btd"}> : () -> ()
    %cst_25 = arith.constant dense<0.000000e+00> : vector<1x8x32xf32>
    %86 = tpu.matmul %83, %85, %cst_25 {dimension_numbers = #tpu.dot_dimension_numbers<[2], [0], [0, 1], [1], [0, 0, 0, 1, 1, 1], [], []>} : vector<1x8x32xbf16>, vector<32x32xbf16>, vector<1x8x32xf32> -> vector<1x8x32xf32>
    "tpu.trace_stop"() : () -> ()
    %c0_26 = arith.constant 0 : index
    %c0_27 = arith.constant 0 : index
    %c0_28 = arith.constant 0 : index
    %87 = vector.load %arg7[%c0_26, %c0_27, %c0_28] : memref<1x1x32xf32, #tpu.memory_space<vmem>>, vector<1x1x32xf32>
    %88 = vector.shape_cast %87 : vector<1x1x32xf32> to vector<1x32xf32>
    %89 = vector.shape_cast %88 : vector<1x32xf32> to vector<1x1x32xf32>
    %90 = vector.broadcast %89 : vector<1x1x32xf32> to vector<1x8x32xf32>
    %91 = arith.addf %86, %90 : vector<1x8x32xf32>
    %92 = arith.addf %3, %91 : vector<1x8x32xf32>
    %c0_29 = arith.constant 0 : index
    %c0_30 = arith.constant 0 : index
    %c0_31 = arith.constant 0 : index
    %93 = vector.load %arg8[%c0_29, %c0_30, %c0_31] : memref<1x1x32xf32, #tpu.memory_space<vmem>>, vector<1x1x32xf32>
    %94 = vector.shape_cast %93 : vector<1x1x32xf32> to vector<1x32xf32>
    %c0_32 = arith.constant 0 : index
    %c0_33 = arith.constant 0 : index
    %c0_34 = arith.constant 0 : index
    %95 = vector.load %arg9[%c0_32, %c0_33, %c0_34] : memref<1x1x32xf32, #tpu.memory_space<vmem>>, vector<1x1x32xf32>
    %96 = vector.shape_cast %95 : vector<1x1x32xf32> to vector<1x32xf32>
    %cst_35 = arith.constant dense<0.000000e+00> : vector<1x8xf32>
    %97 = vector.multi_reduction <add>, %92, %cst_35 [2] : vector<1x8x32xf32> to vector<1x8xf32>
    %98 = vector.shape_cast %97 : vector<1x8xf32> to vector<1x8x1xf32>
    %cst_36 = arith.constant 3.200000e+01 : f32
    %99 = vector.broadcast %cst_36 : f32 to vector<1x8x1xf32>
    %100 = arith.divf %98, %99 : vector<1x8x1xf32>
    %101 = vector.broadcast %100 : vector<1x8x1xf32> to vector<1x8x32xf32>
    %102 = arith.subf %92, %101 : vector<1x8x32xf32>
    %103 = arith.mulf %102, %102 : vector<1x8x32xf32>
    %cst_37 = arith.constant dense<0.000000e+00> : vector<1x8xf32>
    %104 = vector.multi_reduction <add>, %103, %cst_37 [2] : vector<1x8x32xf32> to vector<1x8xf32>
    %105 = vector.shape_cast %104 : vector<1x8xf32> to vector<1x8x1xf32>
    %cst_38 = arith.constant 3.200000e+01 : f32
    %106 = vector.broadcast %cst_38 : f32 to vector<1x8x1xf32>
    %107 = arith.divf %105, %106 : vector<1x8x1xf32>
    %108 = vector.broadcast %100 : vector<1x8x1xf32> to vector<1x8x32xf32>
    %109 = arith.subf %92, %108 : vector<1x8x32xf32>
    %cst_39 = arith.constant 9.99999974E-6 : f32
    %110 = vector.broadcast %cst_39 : f32 to vector<1x8x1xf32>
    %111 = arith.addf %107, %110 : vector<1x8x1xf32>
    %112 = math.rsqrt %111 : vector<1x8x1xf32>
    %113 = vector.broadcast %112 : vector<1x8x1xf32> to vector<1x8x32xf32>
    %114 = arith.mulf %109, %113 : vector<1x8x32xf32>
    %115 = vector.shape_cast %94 : vector<1x32xf32> to vector<1x1x32xf32>
    %116 = vector.broadcast %115 : vector<1x1x32xf32> to vector<1x8x32xf32>
    %117 = arith.mulf %114, %116 : vector<1x8x32xf32>
    %118 = vector.shape_cast %96 : vector<1x32xf32> to vector<1x1x32xf32>
    %119 = vector.broadcast %118 : vector<1x1x32xf32> to vector<1x8x32xf32>
    %120 = arith.addf %117, %119 : vector<1x8x32xf32>
    %121 = arith.truncf %120 : vector<1x8x32xf32> to vector<1x8x32xbf16>
    %c0_40 = arith.constant 0 : index
    %c0_41 = arith.constant 0 : index
    %c0_42 = arith.constant 0 : index
    %122 = vector.load %arg10[%c0_40, %c0_41, %c0_42] : memref<1x32x64xbf16, #tpu.memory_space<vmem>>, vector<1x32x64xbf16>
    %123 = vector.shape_cast %122 : vector<1x32x64xbf16> to vector<32x64xbf16>
    "tpu.trace_start"() <{level = 10 : i32, message = "btc,cf->btf"}> : () -> ()
    %cst_43 = arith.constant dense<0.000000e+00> : vector<1x8x64xf32>
    %124 = tpu.matmul %121, %123, %cst_43 {dimension_numbers = #tpu.dot_dimension_numbers<[2], [0], [0, 1], [1], [0, 0, 0, 1, 1, 1], [], []>} : vector<1x8x32xbf16>, vector<32x64xbf16>, vector<1x8x64xf32> -> vector<1x8x64xf32>
    "tpu.trace_stop"() : () -> ()
    %c0_44 = arith.constant 0 : index
    %c0_45 = arith.constant 0 : index
    %c0_46 = arith.constant 0 : index
    %125 = vector.load %arg11[%c0_44, %c0_45, %c0_46] : memref<1x1x64xf32, #tpu.memory_space<vmem>>, vector<1x1x64xf32>
    %126 = vector.shape_cast %125 : vector<1x1x64xf32> to vector<1x64xf32>
    %127 = vector.shape_cast %126 : vector<1x64xf32> to vector<1x1x64xf32>
    %128 = vector.broadcast %127 : vector<1x1x64xf32> to vector<1x8x64xf32>
    %129 = arith.addf %124, %128 : vector<1x8x64xf32>
    %cst_47 = arith.constant 0.000000e+00 : f32
    %130 = vector.broadcast %cst_47 : f32 to vector<1x8x64xf32>
    %131 = arith.maximumf %129, %130 : vector<1x8x64xf32>
    %132 = arith.truncf %131 : vector<1x8x64xf32> to vector<1x8x64xbf16>
    %c0_48 = arith.constant 0 : index
    %c0_49 = arith.constant 0 : index
    %c0_50 = arith.constant 0 : index
    %133 = vector.load %arg12[%c0_48, %c0_49, %c0_50] : memref<1x64x32xbf16, #tpu.memory_space<vmem>>, vector<1x64x32xbf16>
    %134 = vector.shape_cast %133 : vector<1x64x32xbf16> to vector<64x32xbf16>
    "tpu.trace_start"() <{level = 10 : i32, message = "btf,fc->btc"}> : () -> ()
    %cst_51 = arith.constant dense<0.000000e+00> : vector<1x8x32xf32>
    %135 = tpu.matmul %132, %134, %cst_51 {dimension_numbers = #tpu.dot_dimension_numbers<[2], [0], [0, 1], [1], [0, 0, 0, 1, 1, 1], [], []>} : vector<1x8x64xbf16>, vector<64x32xbf16>, vector<1x8x32xf32> -> vector<1x8x32xf32>
    "tpu.trace_stop"() : () -> ()
    %136 = arith.addf %92, %135 : vector<1x8x32xf32>
    %c0_52 = arith.constant 0 : index
    %c0_53 = arith.constant 0 : index
    %c0_54 = arith.constant 0 : index
    %137 = vector.load %arg13[%c0_52, %c0_53, %c0_54] : memref<1x1x32xf32, #tpu.memory_space<vmem>>, vector<1x1x32xf32>
    %138 = vector.shape_cast %137 : vector<1x1x32xf32> to vector<1x32xf32>
    %139 = vector.shape_cast %138 : vector<1x32xf32> to vector<1x1x32xf32>
    %140 = vector.broadcast %139 : vector<1x1x32xf32> to vector<1x8x32xf32>
    %141 = arith.addf %136, %140 : vector<1x8x32xf32>
    %c0_55 = arith.constant 0 : index
    %c0_56 = arith.constant 0 : index
    %c0_57 = arith.constant 0 : index
    %142 = vector.load %arg17[%c0_55, %c0_56, %c0_57] : memref<1x8x32xf32, #tpu.memory_space<vmem>>, vector<1x8x32xf32>
    tpu.vector_store %arg17[%c0_55, %c0_56, %c0_57], %141 {strides = array<i32>} : memref<1x8x32xf32, #tpu.memory_space<vmem>>, vector<1x8x32xf32>,
    %c1_i32 = arith.constant 1 : i32
    %143 = arith.cmpi eq, %arg1, %c1_i32 : i32
    %144 = arith.extui %143 : i1 to i32
    %c0_i32_58 = arith.constant 0 : i32
    %145 = arith.cmpi ne, %144, %c0_i32_58 : i32
    scf.if %145 {
      %c0_59 = arith.constant 0 : index
      %c0_60 = arith.constant 0 : index
      %146 = vector.load %arg14[%c0_59, %c0_60] : memref<1x32xf32, #tpu.memory_space<vmem>>, vector<1x32xf32>
      %c0_61 = arith.constant 0 : index
      %c0_62 = arith.constant 0 : index
      %147 = vector.load %arg15[%c0_61, %c0_62] : memref<1x32xf32, #tpu.memory_space<vmem>>, vector<1x32xf32>
      %cst_63 = arith.constant dense<0.000000e+00> : vector<1x8xf32>
      %148 = vector.multi_reduction <add>, %141, %cst_63 [2] : vector<1x8x32xf32> to vector<1x8xf32>
      %149 = vector.shape_cast %148 : vector<1x8xf32> to vector<1x8x1xf32>
      %cst_64 = arith.constant 3.200000e+01 : f32
      %150 = vector.broadcast %cst_64 : f32 to vector<1x8x1xf32>
      %151 = arith.divf %149, %150 : vector<1x8x1xf32>
      %152 = vector.broadcast %151 : vector<1x8x1xf32> to vector<1x8x32xf32>
      %153 = arith.subf %141, %152 : vector<1x8x32xf32>
      %154 = arith.mulf %153, %153 : vector<1x8x32xf32>
      %cst_65 = arith.constant dense<0.000000e+00> : vector<1x8xf32>
      %155 = vector.multi_reduction <add>, %154, %cst_65 [2] : vector<1x8x32xf32> to vector<1x8xf32>
      %156 = vector.shape_cast %155 : vector<1x8xf32> to vector<1x8x1xf32>
      %cst_66 = arith.constant 3.200000e+01 : f32
      %157 = vector.broadcast %cst_66 : f32 to vector<1x8x1xf32>
      %158 = arith.divf %156, %157 : vector<1x8x1xf32>
      %159 = vector.broadcast %151 : vector<1x8x1xf32> to vector<1x8x32xf32>
      %160 = arith.subf %141, %159 : vector<1x8x32xf32>
      %cst_67 = arith.constant 9.99999974E-6 : f32
      %161 = vector.broadcast %cst_67 : f32 to vector<1x8x1xf32>
      %162 = arith.addf %158, %161 : vector<1x8x1xf32>
      %163 = math.rsqrt %162 : vector<1x8x1xf32>
      %164 = vector.broadcast %163 : vector<1x8x1xf32> to vector<1x8x32xf32>
      %165 = arith.mulf %160, %164 : vector<1x8x32xf32>
      %166 = vector.shape_cast %146 : vector<1x32xf32> to vector<1x1x32xf32>
      %167 = vector.broadcast %166 : vector<1x1x32xf32> to vector<1x8x32xf32>
      %168 = arith.mulf %165, %167 : vector<1x8x32xf32>
      %169 = vector.shape_cast %147 : vector<1x32xf32> to vector<1x1x32xf32>
      %170 = vector.broadcast %169 : vector<1x1x32xf32> to vector<1x8x32xf32>
      %171 = arith.addf %168, %170 : vector<1x8x32xf32>
      %172 = arith.truncf %171 : vector<1x8x32xf32> to vector<1x8x32xbf16>
      %c0_68 = arith.constant 0 : index
      %c0_69 = arith.constant 0 : index
      %c0_70 = arith.constant 0 : index
      %173 = vector.load %arg16[%c0_68, %c0_69, %c0_70] : memref<1x8x32xbf16, #tpu.memory_space<vmem>>, vector<1x8x32xbf16>
      tpu.vector_store %arg16[%c0_68, %c0_69, %c0_70], %172 {strides = array<i32>} : memref<1x8x32xbf16, #tpu.memory_space<vmem>>, vector<1x8x32xbf16>,
    } else {
    }
    return
  }
  func.func @transform_0(%arg0: i32, %arg1: i32) -> (i32, i32, i32) {
    %c0_i32 = arith.constant 0 : i32
    %c0_i32_0 = arith.constant 0 : i32
    %c0_i32_1 = arith.constant 0 : i32
    return %arg0, %c0_i32, %c0_i32_0 : i32, i32, i32
  }
  func.func @transform_1(%arg0: i32, %arg1: i32) -> (i32, i32, i32) {
    %c0_i32 = arith.constant 0 : i32
    %c0_i32_0 = arith.constant 0 : i32
    %c0_i32_1 = arith.constant 0 : i32
    return %arg1, %c0_i32, %c0_i32_0 : i32, i32, i32
  }
  func.func @transform_2(%arg0: i32, %arg1: i32) -> (i32, i32, i32) {
    %c0_i32 = arith.constant 0 : i32
    %c0_i32_0 = arith.constant 0 : i32
    %c0_i32_1 = arith.constant 0 : i32
    return %arg1, %c0_i32, %c0_i32_0 : i32, i32, i32
  }
  func.func @transform_3(%arg0: i32, %arg1: i32) -> (i32, i32, i32) {
    %c0_i32 = arith.constant 0 : i32
    %c0_i32_0 = arith.constant 0 : i32
    %c0_i32_1 = arith.constant 0 : i32
    return %arg1, %c0_i32, %c0_i32_0 : i32, i32, i32
  }
  func.func @transform_4(%arg0: i32, %arg1: i32) -> (i32, i32, i32) {
    %c0_i32 = arith.constant 0 : i32
    %c0_i32_0 = arith.constant 0 : i32
    %c0_i32_1 = arith.constant 0 : i32
    return %arg1, %c0_i32, %c0_i32_0 : i32, i32, i32
  }
  func.func @transform_5(%arg0: i32, %arg1: i32) -> (i32, i32, i32) {
    %c0_i32 = arith.constant 0 : i32
    %c0_i32_0 = arith.constant 0 : i32
    %c0_i32_1 = arith.constant 0 : i32
    return %arg1, %c0_i32, %c0_i32_0 : i32, i32, i32
  }
  func.func @transform_6(%arg0: i32, %arg1: i32) -> (i32, i32, i32) {
    %c0_i32 = arith.constant 0 : i32
    %c0_i32_0 = arith.constant 0 : i32
    %c0_i32_1 = arith.constant 0 : i32
    return %arg1, %c0_i32, %c0_i32_0 : i32, i32, i32
  }
  func.func @transform_7(%arg0: i32, %arg1: i32) -> (i32, i32, i32) {
    %c0_i32 = arith.constant 0 : i32
    %c0_i32_0 = arith.constant 0 : i32
    %c0_i32_1 = arith.constant 0 : i32
    return %arg1, %c0_i32, %c0_i32_0 : i32, i32, i32
  }
  func.func @transform_8(%arg0: i32, %arg1: i32) -> (i32, i32, i32) {
    %c0_i32 = arith.constant 0 : i32
    %c0_i32_0 = arith.constant 0 : i32
    %c0_i32_1 = arith.constant 0 : i32
    return %arg1, %c0_i32, %c0_i32_0 : i32, i32, i32
  }
  func.func @transform_9(%arg0: i32, %arg1: i32) -> (i32, i32, i32) {
    %c0_i32 = arith.constant 0 : i32
    %c0_i32_0 = arith.constant 0 : i32
    %c0_i32_1 = arith.constant 0 : i32
    return %arg1, %c0_i32, %c0_i32_0 : i32, i32, i32
  }
  func.func @transform_10(%arg0: i32, %arg1: i32) -> (i32, i32, i32) {
    %c0_i32 = arith.constant 0 : i32
    %c0_i32_0 = arith.constant 0 : i32
    %c0_i32_1 = arith.constant 0 : i32
    return %arg1, %c0_i32, %c0_i32_0 : i32, i32, i32
  }
  func.func @transform_11(%arg0: i32, %arg1: i32) -> (i32, i32, i32) {
    %c0_i32 = arith.constant 0 : i32
    %c0_i32_0 = arith.constant 0 : i32
    %c0_i32_1 = arith.constant 0 : i32
    return %arg1, %c0_i32, %c0_i32_0 : i32, i32, i32
  }
  func.func @transform_12(%arg0: i32, %arg1: i32) -> (i32, i32) {
    %c0_i32 = arith.constant 0 : i32
    %c0_i32_0 = arith.constant 0 : i32
    %c0_i32_1 = arith.constant 0 : i32
    return %c0_i32, %c0_i32_0 : i32, i32
  }
  func.func @transform_13(%arg0: i32, %arg1: i32) -> (i32, i32) {
    %c0_i32 = arith.constant 0 : i32
    %c0_i32_0 = arith.constant 0 : i32
    %c0_i32_1 = arith.constant 0 : i32
    return %c0_i32, %c0_i32_0 : i32, i32
  }
  func.func @transform_14(%arg0: i32, %arg1: i32) -> (i32, i32, i32) {
    %c0_i32 = arith.constant 0 : i32
    %c0_i32_0 = arith.constant 0 : i32
    %c0_i32_1 = arith.constant 0 : i32
    return %arg0, %c0_i32, %c0_i32_0 : i32, i32, i32
  }
}

</mosaic_0001>

<bundles_post_ra>
// kernel: tpu_custom_call.1
= control target key start
LH: loop header
LB: loop body
LE: loop exit
PB: predicated region body
PF: predicated region fallthrough
CT: control target
= control target key end

     0   :  { %s2508_s0 = inlined_call_operand.hbm [shape: f32[2,8,32], index: 0, kind: input, shape index: {}]   ;;  %s2509_s1 = inlined_call_operand.hbm [shape: f32[2,1,32], index: 1, kind: input, shape index: {}]   ;;  %s2510_s2 = inlined_call_operand.hbm [shape: f32[2,1,32], index: 2, kind: input, shape index: {}]   ;;  %s2511_s3 = inlined_call_operand.vmem [shape: bf16[2,32,96], index: 3, kind: input, shape index: {}]   ;;  %s2512_s4 = inlined_call_operand.vmem [shape: bf16[2,32,32], index: 4, kind: input, shape index: {}]   ;;  %s2513_s5 = inlined_call_operand.vmem [shape: f32[2,1,32], index: 5, kind: input, shape index: {}]   ;;  %s2514_s6 = inlined_call_operand.vmem [shape: f32[2,1,32], index: 6, kind: input, shape index: {}]   ;;  %s2515_s7 = inlined_call_operand.hbm [shape: f32[2,1,32], index: 7, kind: input, shape index: {}]   ;;  %s2516_s8 = inlined_call_operand.vmem [shape: bf16[2,32,64], index: 8, kind: input, shape index: {}]   ;;  %s2517_s9 = inlined_call_operand.vmem [shape: f32[2,1,64], index: 9, kind: input, shape index: {}]   ;;  %s2518_s10 = inlined_call_operand.vmem [shape: bf16[2,64,32], index: 10, kind: input, shape index: {}]   ;;  %s2519_s11 = inlined_call_operand.vmem [shape: f32[2,1,32], index: 11, kind: input, shape index: {}]   ;;  %s2520_s12 = inlined_call_operand.vmem [shape: f32[1,32], index: 12, kind: input, shape index: {}]   ;;  %s2521_s13 = inlined_call_operand.vmem [shape: f32[1,32], index: 13, kind: input, shape index: {}]   ;;  %s2522_s14 = inlined_call_operand.hbm [shape: bf16[2,8,32], index: 14, kind: output, shape index: {}]  }
   0x1   :  { %2536 = sst [smem:[#allocation30_spill]] %s2508_s0 }
   0x2   :  { %2537 = sst [smem:[#allocation31_spill]] %s2509_s1 }
   0x3   :  { %2538 = sst [smem:[#allocation32_spill]] %s2510_s2 }
   0x4   :  { %2539 = sst [smem:[#allocation33_spill]] %s2511_s3 }
   0x5   :  { %2540 = sst [smem:[#allocation34_spill]] %s2512_s4 }
   0x6   :  { %2541 = sst [smem:[#allocation35_spill]] %s2514_s6 }
   0x7   :  { %2542 = sst [smem:[#allocation36_spill]] %s2515_s7 }
   0x8   :  { %2543 = sst [smem:[#allocation37_spill]] %s2516_s8 }
   0x9   :  { %2544 = sst [smem:[#allocation38_spill]] %s2517_s9 }
   0xa   :  { %2545 = sst [smem:[#allocation39_spill]] %s2518_s10 }
   0xb   :  { %2546 = sst [smem:[#allocation40_spill]] %s2519_s11 }
   0xc   :  { %2547 = sst [smem:[#allocation41_spill]] %s2520_s12 }
   0xd   :  { %2548 = sst [smem:[#allocation42_spill]] %s2521_s13 }
   0xe   :  { %2549 = sst [smem:[#allocation43_spill]] %s2522_s14 }
   0xf   :  { %19 = vsyncpa [#allocation4], 0 }
  0x10   :  { %21 = vsyncpa [#allocation4 + $0x1], 0 }
  0x11   :  { %22 = vsyncpa [#allocation7], 0 }
  0x12   :  { %24 = vsyncpa [#allocation7 + $0x1], 0 }
  0x13   :  { %25 = vsyncpa [#allocation10], 0 }
  0x14   :  { %27 = vsyncpa [#allocation10 + $0x1], 0 }
  0x15   :  { %28 = vsyncpa [#allocation5], 0 }
  0x16   :  { %30 = vsyncpa [#allocation5 + $0x1], 0  ;;  %s2112_s29 = smov 0   ;;  %s2114_s30 = smov 0  }
  0x17   :  { %s2116_s15 = smov 0   ;;  %s2118_s16 = smov 0  }
  0x18   :  { %s2120_s17 = smov 0   ;;  %s2122_s18 = smov 0  }
  0x19   :  { %s2124_s19 = smov 0   ;;  %s2126_s20 = smov 0  }
  0x1a   :  { %s2128_s21 = smov 0   ;;  %s2130_s22 = smov 0  }
  0x1b   :  { %s2132_s23 = smov 0  }
  0x1c LB: > { %2550 = sst [smem:[#allocation16_spill]] %s1990_s30  ;;  %s2166_s24 = sadd.s32 4294967295, %s2026_s23   ;;  %s2026_s23 = sphi %s2132_s23, %s36_s23   ;;  %s2022_s22 = sphi %s2130_s22, %s2606_s22   ;;  %s2018_s21 = sphi %s2128_s21, %s2605_s21   ;;  %s2014_s20 = sphi %s2126_s20, %s2604_s20   ;;  %s2010_s19 = sphi %s2124_s19, %s2603_s19   ;;  %s2006_s18 = sphi %s2122_s18, %s2602_s18   ;;  %s2002_s17 = sphi %s2120_s17, %s2601_s17   ;;  %s1998_s16 = sphi %s2118_s16, %s2600_s16   ;;  %s1994_s15 = sphi %s2116_s15, %s2599_s15   ;;  %s1990_s30 = sphi %s2114_s30, %s2598_s30   ;;  %s1986_s29 = sphi %s2112_s29, %s2597_s29  }
  0x1d   : > { %2551 = sst [smem:[#allocation17_spill]] %s1994_s15  ;;  %s45_s25 = sadd.s32 1, %s2018_s21 }
  0x1e   : > { %2552 = sst [smem:[#allocation18_spill]] %s1998_s16  ;;  %p2169_p0 = scmp.ge.s32.totalorder %s45_s25, 2 }
  0x1f   : > { %2553 = sst [smem:[#allocation19_spill]] %s2002_s17  ;;  %p63_p1 = scmp.eq.s32.totalorder %s2026_s23, 0 }
  0x20   : > { %2554 = sst [smem:[#allocation20_spill]] %s2006_s18  ;;  %p69_p2 = scmp.eq.s32.totalorder %s2166_s24, 0 }
  0x21   : > { %2555 = sst [smem:[#allocation21_spill]] %s2014_s20  ;;  %s81_s27 = sadd.s32 1, %s1994_s15 }
  0x22   : > { %2556 = sst [smem:[#allocation22_spill]] %s2018_s21  ;;  %s2608_s25 = smov (%p2169_p0, %s45_s25), 0 }
  0x23   : > { %2557 = sst [smem:[#allocation23_spill]] %s2022_s22  ;;  %p88_p3 = scmp.ne.s32.totalorder %s1994_s15, %s1990_s30 }
  0x24   : > { %2559 = sst [smem:[#allocation24_spill]] %s2608_s25  ;;  %p94_p4 = scmp.ne.s32.totalorder %s1990_s30, %s1986_s29 }
  0x25   : > { %s78_s28 = ssub.s32 %s2018_s21, %s2608_s25  ;;  %p90_p6 = por %p88_p3, %p63_p1 }
  0x26   : > { %p79_p5 = scmp.eq.s32.totalorder %s78_s28, 0  ;;  %p2189_p7 = por %p94_p4, %p69_p2 }
  0x27   : > { %p1644_p8 = scmp.lt.s32.totalorder %s2026_s23, 4  ;;  %s471_s13 = sand.u32 1, %s2026_s23  }
  0x28   : > { %s2195_s20 = scalar_select %p79_p5, %s1994_s15, %s81_s27  }
  0x29   : > { %s2199_s29 = sand.u32 1, %s1994_s15   ;;  %s2562_s1 = sld [smem:[#allocation31_spill]] }
  0x2a   : > { %2561 = sst [smem:[#allocation25_spill]] %s2195_s20  ;;  %s474_s11 = scalar_lea.vmem [#allocation6], %s2199_s29 }
  0x2b   : > { %s481_s10 = sshll.u32 %s474_s11, 4  ;;  %p2208_p9 = pnand %p1644_p8, %p90_p6  ;;  %s482_s10 = int_to_ptr.vmem [resolvable:$true] %s481_s10 }
  0x2c   : > { %p1534_p10 = scmp.ge.s32.totalorder %s2026_s23, 1  ;;  %p576_p11 = scmp.lt.s32.totalorder %s2026_s23, 5 }
  0x2d   : > { %s2214_s12 = scalar_lea.sflag [#allocation7], %s471_s13  ;;  %s1529_s25 = sadd.s32 4294967294, %s2026_s23  }
  0x2e   : > { %p2219_p12 = pnand %p1534_p10, %p576_p11  ;;  %p62_p13 = scmp.ne.s32.totalorder %s2006_s18, %s2002_s17 }
  0x2f   : > { %s477_s28 = scalar_lea.hbm %s2562_s1, %s2018_s21  ;;  %s55_s1 = sadd.s32 1, %s2006_s18 }
  0x30   : > { %s479_s27 = sshll.u32 %s477_s28, 4  ;;  %s48_s28 = sadd.s32 1, %s2022_s22  ;;  %s480_s27 = int_to_ptr.hbm [resolvable:$true] %s479_s27 }
  0x31   : > { %1633 = dma.hbm_to_vmem [thread:$0]  (!%p2208_p9), %s480_s27, 16, %s482_s10, %s2214_s12  }
  0x32   : > { %s2610_s28 = smov (!%p2169_p0, %s48_s28), %s2022_s22  ;;  %p68_p4 = scmp.ne.s32.totalorder %s2002_s17, %s1998_s16 }
  0x33   : > { %p50_p3 = scmp.ge.s32.totalorder %s2610_s28, 2  ;;  %p2235_p5 = por %p63_p1, %p62_p13 }
  0x34   : > { %p420_p6 = scmp.eq.s32.totalorder %s2166_s24, 3  ;;  %p2244_p10 = por %p69_p2, %p68_p4 }
  0x35   : > { %s2612_s28 = smov (%p50_p3, %s2610_s28), 0  ;;  %p426_p1 = scmp.eq.s32.totalorder %s1529_s25, 3 }
  0x36   : > { %2566 = sst [smem:[#allocation26_spill]] %s2612_s28  ;;  %p2248_p0 = por %p420_p6, %p62_p13 }
  0x37   : > { %s52_s27 = ssub.s32 %s2022_s22, %s2612_s28  ;;  %s452_s15 = sand.u32 1, %s2006_s18  }
  0x38   : > { %s2568_s26 = scalar_select %p2248_p0, 1, 0 }
  0x39   : > { %p53_p11 = scmp.eq.s32.totalorder %s52_s27, 0  ;;  %p2255_p3 = por %p426_p1, %p68_p4 }
  0x3a   : > { %2569 = sst [smem:[#allocation27_spill]] %s2568_s26  ;;  %s1532_s8 = sshll.u32 %s452_s15, 3 }
  0x3b   : > { %s2570_s16 = scalar_select %p2255_p3, 1, 0 }
  0x3c   : > { %s2260_s9 = scalar_select %p53_p11, %s2006_s18, %s55_s1  }
  0x3d   : > { %2571 = sst [smem:[#allocation28_spill]] %s2570_s16  ;;  %s1533_s6 = sshll.u32 %s2022_s22, 3 }
  0x3e   : > { %2572 = sst [smem:[#allocation29_spill]] %s2260_s9  ;;  %s456_s25 = scalar_lea.vmem [#allocation3], %s1532_s8 }
  0x3f   : > { %s2573_s0 = sld [smem:[#allocation30_spill]]  ;;  %s464_s27 = sshll.u32 %s456_s25, 4  ;;  %s465_s27 = int_to_ptr.vmem [resolvable:$true] %s464_s27 }
  0x40   : > { %p1628_p2 = pnand %p1644_p8, %p2235_p5  ;;  %s2574_s2 = sld [smem:[#allocation32_spill]] }
  0x41   : > { %s491_s3 = scalar_lea.vmem [#allocation8], %s2199_s29  ;;  %s2575_s7 = sld [smem:[#allocation36_spill]] }
  0x42   : > { %s498_s4 = sshll.u32 %s491_s3, 4  ;;  %s536_s25 = scalar_lea.vmem [#allocation9], %s2199_s29  ;;  %s499_s4 = int_to_ptr.vmem [resolvable:$true] %s498_s4 }
  0x43   : > { %s534_s9 = scalar_lea.sflag [#allocation10], %s2199_s29 }
  0x45   : > { %s460_s26 = scalar_lea.hbm %s2573_s0, %s1533_s6  ;;  %s453_s6 = scalar_lea.sflag [#allocation4], %s452_s15 }
  0x46   : > { %s462_s28 = sshll.u32 %s460_s26, 4  ;;  %s494_s22 = scalar_lea.hbm %s2574_s2, %s2018_s21  ;;  %s463_s28 = int_to_ptr.hbm [resolvable:$true] %s462_s28 }
  0x47   : > { %s496_s18 = sshll.u32 %s494_s22, 4  ;;  %s539_s13 = scalar_lea.hbm %s2575_s7, %s2018_s21  ;;  %s497_s18 = int_to_ptr.hbm [resolvable:$true] %s496_s18 }
  0x48   : > { %1630 = dma.hbm_to_vmem [thread:$0]  (!%p1628_p2), %s463_s28, 128, %s465_s27, %s453_s6  }
  0x49   : > { %1636 = dma.hbm_to_vmem [thread:$0]  (!%p2208_p9), %s497_s18, 16, %s499_s4, %s2214_s12  }
  0x4a   : > { %s543_s0 = sshll.u32 %s536_s25, 4  ;;  %s541_s16 = sshll.u32 %s539_s13, 4  ;;  %s544_s0 = int_to_ptr.vmem [resolvable:$true] %s543_s0  ;;  %s542_s16 = int_to_ptr.hbm [resolvable:$true] %s541_s16 }
  0x4b   : > { %1639 = dma.hbm_to_vmem [thread:$0]  (!%p2208_p9), %s542_s16, 16, %s544_s0, %s534_s9  }
  0x4c   : > { %580 = sbr.rel (%p2219_p12) target bundleno = 2245 (0x8c5), region = 76  ;;  %s2289_s15 = sand.u32 (!%p2219_p12), 1, %s2002_s17  }
  0x4d   : > { %s1535_s18 = sshll.u32 (!%p2219_p12), %s2289_s15, 3  ;;  %s583_s22 = scalar_lea.sflag (!%p2219_p12), [#allocation4], %s2289_s15 }
  0x4e   : > { %s586_s12 = scalar_lea.vmem (!%p2219_p12), [#allocation3], %s1535_s18 }
  0x51   : > { %1969 = dma.done.wait (%p2244_p10), %s583_s22, 128  }
  0x52   : > { %1971 = vsyncadd (%p2244_p10), %s583_s22, 4294967168  ;;  %s592_s0 = sand.u32 1, %s2166_s24   ;;  %s2299_s16 = sand.u32 1, %s1990_s30  }
  0x53   : > { %s593_s20 = scalar_lea.sflag [#allocation7], %s592_s0 }
  0x54   : > { %1973 = dma.done.wait (%p2189_p7), %s593_s20, 32  }
  0x55   : > { %1975 = vsyncadd (%p2189_p7), %s593_s20, 4294967264  ;;  %s611_s28 = scalar_lea.sflag [#allocation10], %s2299_s16 }
  0x56   : > { %1977 = dma.done.wait (%p2189_p7), %s611_s28, 16  }
  0x57   : > { %1979 = vsyncadd (%p2189_p7), %s611_s28, 4294967280  ;;  %s1536_s24 = sshll.u32 %s2289_s15, 2  ;;  %p703_p8 = scmp.lt.s32.totalorder %s2010_s19, 1 }
  0x58   : > { %s2576_s26 = sld [smem:[#allocation33_spill]]  ;;  %s2356_s20 = scalar_lea.vmem [#allocation11], %s1536_s24 }
  0x59   : > { %s2316_s27 = scalar_select %p703_p8, %s2010_s19, 1 }
  0x5a   : > { %s2577_s18 = sld [smem:[#allocation34_spill]]  ;;  %p1545_p7 = scmp.ne.s32.totalorder %s2010_s19, 0 }
  0x5b   : > { %s1603_s1 = sshll.u32 %s2316_s27, 4  ;;  %s2578_s28 = sld [smem:[#allocation35_spill]] }
  0x5c   : > { %s2579_s2 = sld [smem:[#allocation37_spill]]  ;;  %s1606_s8 = sshll.u32 %s2316_s27, 5 }
  0x5d   : > { %s2580_s6 = sld [smem:[#allocation38_spill]] }
  0x5e   : > { %s2326_s13 = scalar_lea.vmem %s2576_s26, %s1603_s1  ;;  %s2581_s17 = sld [smem:[#allocation39_spill]] }
  0x5f   : > { %s2582_s30 = sld [smem:[#allocation40_spill]] }
  0x60   : > { %s2331_s22 = scalar_lea.vmem %s2577_s18, %s1603_s1 }
  0x61   : > { %s718_s10 = scalar_lea.vmem %s2578_s28, %s2316_s27  ;;  %739 = sbr.rel (%p1545_p7) target bundleno = 104 (0x68), region = 96 }
  0x62   : > { %s2340_s7 = scalar_lea.vmem %s2579_s2, %s1603_s1 }
  0x63   : > { %s726_s14 = scalar_lea.vmem %s2580_s6, %s2316_s27 }
  0x64   : > { %s2350_s25 = scalar_lea.vmem %s2581_s17, %s1606_s8 }
  0x65   : > { %s734_s0 = scalar_lea.vmem %s2582_s30, %s2316_s27 }
  0x66   : > { %v740_v0 = vld [vmem:[%s586_s12] sm:$0xff]  ;;  %vm741_vm0 = vcmask 261120  }
  0x67   : > { %742 = vst.msk [vmem:[#allocation2] sm:$0xff] %vm741_vm0, %v740_v0 }
  0x68 PF: > { %vm746_vm1 = vcmask 261120   ;;  %v2028_v3 = vmov 32.0   ;;  %v1608_v15 = vld [vmem:[%s2326_s13 + $0x8] sm:$0xff]  ;;  %v1607_v16 = vld [vmem:[%s2326_s13] sm:$0xff]  ;;  %s2583_s2 = scalar_lea.vmem [#allocation6], %s2299_s16  ;;  %s2584_s30 = scalar_lea.vmem [#allocation8], %s2299_s16  ;;  %v831_v58 = vlaneseq }
  0x69   : > { %1750 = vrcp.f32 %v2028_v3  ;;  %810 = vmatpush.bf16.msra.mxu0 %v1608_v15  ;;  %v1743_v26 = vld [vmem:[%s2583_s2] ss:$0 sm:$0xff]  ;;  %s2029_s17 = smov 104   ;;  %s2030_s21 = smov 120   ;;  %vm841_vm6 = vcmask 64512   ;;  %vm984_vm8 = vcmask 1043456  }
  0x6a   : > { %v1744_v29 = vld [vmem:[%s2584_s30] ss:$0 sm:$0xff]  ;;  %s2031_s12 = smov 112   ;;  %s2032_s29 = smov 96   ;;  %v832_v59 = vshrl.u32 %v831_v58, 7  ;;  %v834_v60 = vand.u32 127, %v831_v58 }
  0x6b   : > { %s2033_s11 = smov 64   ;;  %s2034_s24 = smov 24   ;;  %vm1085_vm9 = vcmask 130048   ;;  %vm1087_vm10 = vcmask 195584   ;;  %vm1230_vm14 = vcmask 523264  }
  0x6c   : > { %vm835_vm7 = vcmp.le.s32.totalorder %v834_v60, %v832_v59  ;;  %s2035_s1 = smov 8   ;;  %s2036_s6 = smov 16  }
  0x6d   : > { %811 = vmatpush.bf16.msra.mxu0 %v1607_v16  ;;  %s2585_s28 = scalar_lea.vmem %s2513_s5, %s2316_s27  ;;  %s2587_s8 = scalar_lea.vmem [#allocation9], %s2299_s16 }
  0x6e   : > { %v2359_v1 = vld [vmem:[#allocation2] sm:$0xff]  ;;  %p1598_p9 = scmp.ne.s32.totalorder %s2010_s19, 1 }
  0x6f   : > { %v747_v2 = vsel %vm746_vm1, %v2359_v1, 0.0  ;;  %v1751_v4 = vpop.eup %1750  ;;  %s2591_s30 = sld [smem:[#allocation42_spill]] (!%p1598_p9) }
  0x70   : > { %748 = vadd.xlane.f32.xlu0 %v747_v2  ;;  %v751_v5 = vmul.f32 32.0, %v1751_v4  ;;  %vm755_vm2 = vweird.f32 %v1751_v4 }
  0x72   : > { %v752_v6 = vsub.f32 1.0, %v751_v5 }
  0x74   : > { %v753_v7 = vmul.f32 %v1751_v4, %v752_v6 }
  0x76   : > { %v754_v8 = vadd.f32 %v1751_v4, %v753_v7 }
  0x78   : > { %v2363_v9 = vsel %vm755_vm2, %v1751_v4, %v754_v8 }
  0xe3   : > { %v749_v10 = vpop.xlane.xlu0 %748 }
  0xe4   : > { %v757_v11 = vmul.f32 %v2363_v9, %v749_v10 }
  0xe6   : > { %v758_v12 = vsub.f32 %v2359_v1, %v757_v11 }
  0xe8   : > { %v759_v13 = vmul.f32 %v758_v12, %v758_v12 }
  0xea   : > { %v760_v14 = vsel %vm746_vm1, %v759_v13, 0.0 }
  0xeb   : > { %761 = vadd.xlane.f32.xlu0 %v760_v14 }
 0x15e   : > { %v762_v17 = vpop.xlane.xlu0 %761 }
 0x15f   : > { %v763_v18 = vmul.f32 %v762_v17, %v2363_v9 }
 0x161   : > { %v764_v19 = vadd.f32 1e-05, %v763_v18 }
 0x163   : > { %1752 = vrsqrt.f32 %v764_v19  ;;  %vm771_vm4 = vweird.f32 %v764_v19 }
 0x169   : > { %v1753_v20 = vpop.eup %1752 }
 0x16a   : > { %v766_v21 = vmul.f32 %v1753_v20, %v764_v19  ;;  %vm772_vm3 = vweird.f32 %v1753_v20 }
 0x16b   : > { %vm773_vm5 = vmor %vm771_vm4, %vm772_vm3 }
 0x16c   : > { %v767_v22 = vmul.f32 %v1753_v20, %v766_v21 }
 0x16e   : > { %v768_v23 = vmul.f32 0.5, %v767_v22 }
 0x170   : > { %v769_v24 = vsub.f32 1.5, %v768_v23 }
 0x172   : > { %v770_v25 = vmul.f32 %v1753_v20, %v769_v24 }
 0x174   : > { %v774_v27 = vsel %vm773_vm5, %v1753_v20, %v770_v25 }
 0x175   : > { %v775_v28 = vmul.f32 %v774_v27, %v758_v12 }
 0x177   : > { %v779_v30 = vmul.f32 %v1743_v26, %v775_v28 }
 0x179   : > { %v783_v31 = vadd.f32 %v1744_v29, %v779_v30 }
 0x17b   : > { %v784_v32 = vpack.c.bf16 %v783_v31, %v783_v31 }
 0x17d   : > { %1554 = vmatmul.msk.bf16.vlgmr.msra.gmra.mxu0 %vm746_vm1, %v784_v32 }
 0x1fa   : > { %v813_v33 = vpop.f32.mrf.mxu0 }
 0x1fb   : > { %824 = vrot.lane.b32.xlu2 %v813_v33, %s2029_s17  ;;  %818 = vrot.lane.b32.xlu1 %v813_v33, %s2030_s21  ;;  %v827_v42 = vpack.c.bf16 %v813_v33, %v813_v33 }
 0x1fd   : > { %v837_v46 = vunpack.c.l.b16 %v827_v42 }
 0x1ff   : > { %v838_v49 = vpack.c.b16 %v837_v46, %v837_v46 }
 0x202   : > { %v815_v34 = vpop.f32.mrf.mxu0 }
 0x203   : > { %821 = vrot.lane.b32.xlu1 %v813_v33, %s2031_s12 }
 0x255   : > { %v825_v35 = vpop.permute.xlu2 %824 }
 0x256   : > { %v830_v36 = vpack.c.bf16 %v825_v35, %v825_v35 }
 0x258   : > { %v910_v37 = vunpack.c.l.b16 %v830_v36 }
 0x25a   : > { %v911_v38 = vpack.c.b16 %v910_v37, %v910_v37 }
 0x25c   : > { %912 = vrot.lane.b32.xlu1 %v911_v38, %s2032_s29 }
 0x26d   : > { %v819_v39 = vpop.permute.xlu1 %818 }
 0x26e   : > { %v828_v40 = vpack.c.bf16 %v819_v39, %v819_v39 }
 0x270   : > { %v862_v41 = vunpack.c.l.b16 %v828_v40 }
 0x272   : > { %v863_v43 = vpack.c.b16 %v862_v41, %v862_v41 }
 0x274   : > { %864 = vrot.lane.b32.xlu2 %v863_v43, %s2032_s29 }
 0x275   : > { %v822_v44 = vpop.permute.xlu1 %821 }
 0x276   : > { %v829_v45 = vpack.c.bf16 %v822_v44, %v822_v44 }
 0x278   : > { %v886_v47 = vunpack.c.l.b16 %v829_v45 }
 0x27a   : > { %v887_v48 = vpack.c.b16 %v886_v47, %v886_v47 }
 0x27c   : > { %888 = vrot.lane.b32.xlu0 %v887_v48, %s2032_s29  ;;  %839 = vrot.lane.b32.xlu2 %v838_v49, %s2032_s29 }
 0x2ce   : > { %v865_v50 = vpop.permute.xlu2 %864  ;;  %v913_v51 = vpop.permute.xlu1 %912 }
 0x2cf   : > { %v870_v52 = vsel %vm841_vm6, %v865_v50, 0  ;;  %v918_v53 = vsel %vm841_vm6, %v913_v51, 0 }
 0x2d0   : > { %879 = vmatpush.bf16.xpose.msra.mxu2 %v870_v52  ;;  %927 = vmatpush.bf16.xpose.msrb.mxu0 %v918_v53 }
 0x2d6   : > { %v840_v54 = vpop.permute.xlu2 %839 }
 0x2d7   : > { %1556 = vmatmul.msk.bf16.vlgmr.msra.gmra.mxu2 %vm841_vm6, %v828_v40  ;;  %1558 = vmatmul.msk.bf16.vlgmr.msrb.gmra.mxu0 %vm841_vm6, %v830_v36  ;;  %v846_v55 = vsel %vm841_vm6, %v840_v54, 0 }
 0x2d8   : > { %855 = vmatpush.bf16.xpose.msra.mxu1 %v846_v55 }
 0x2df   : > { %1555 = vmatmul.msk.bf16.vlgmr.msra.gmra.mxu1 %vm841_vm6, %v827_v42 }
 0x2ee   : > { %v889_v56 = vpop.permute.xlu0 %888 }
 0x2ef   : > { %v894_v57 = vsel %vm841_vm6, %v889_v56, 0 }
 0x2f0   : > { %903 = vmatpush.bf16.xpose.msra.mxu3 %v894_v57 }
 0x2f7   : > { %1557 = vmatmul.msk.bf16.vlgmr.msra.gmra.mxu3 %vm841_vm6, %v829_v45 }
 0x354   : > { %v929_v61 = vpop.f32.mrf.mxu0 }
 0x355   : > { %v938_v62 = vsel %vm835_vm7, %v929_v61, -1e+09 }
 0x356   : > { %v948_v63 = vsel %vm841_vm6, %v938_v62, -inf }
 0x357   : > { %949 = vmax.xlane.f32.xlu0 %v948_v63 }
 0x35a   : > { %v881_v0 = vpop.f32.mrf.mxu2 }
 0x35b   : > { %v936_v2 = vsel %vm835_vm7, %v881_v0, -1e+09 }
 0x35c   : > { %v857_v3 = vpop.f32.mrf.mxu1  ;;  %v931_v4 = vpop.f32.mrf.mxu0  ;;  %v942_v5 = vsel %vm841_vm6, %v936_v2, -inf }
 0x35d   : > { %v935_v6 = vsel %vm835_vm7, %v857_v3, -1e+09  ;;  %943 = vmax.xlane.f32.xlu1 %v942_v5 }
 0x35e   : > { %v939_v14 = vsel %vm841_vm6, %v935_v6, -inf }
 0x362   : > { %v883_v7 = vpop.f32.mrf.mxu2 }
 0x364   : > { %v859_v8 = vpop.f32.mrf.mxu1 }
 0x36b   : > { %1043 = vrot.lane.b32.xlu0 %v911_v38, %s2033_s11 }
 0x376   : > { %1022 = vrot.lane.b32.xlu1 %v887_v48, %s2033_s11 }
 0x37a   : > { %v905_v10 = vpop.f32.mrf.mxu3 }
 0x37b   : > { %v937_v11 = vsel %vm835_vm7, %v905_v10, -1e+09 }
 0x37c   : > { %v945_v12 = vsel %vm841_vm6, %v937_v11, -inf }
 0x37d   : > { %946 = vmax.xlane.f32.xlu2 %v945_v12 }
 0x37e   : > { %979 = vrot.lane.b32.xlu1 %v838_v49, %s2033_s11 }
 0x382   : > { %v907_v13 = vpop.f32.mrf.mxu3 }
 0x395   : > { %1001 = vrot.lane.b32.xlu2 %v863_v43, %s2033_s11 }
 0x3be   : > { %940 = vmax.xlane.f32.xlu2 %v939_v14  ;;  %v1745_v14 = vld [vmem:[%s2585_s28] ss:$0 sm:$0xff] }
 0x3ca   : > { %v950_v15 = vpop.xlane.xlu0 %949 }
 0x3cb   : > { %v954_v16 = vsub.f32 %v938_v62, %v950_v15  ;;  %v1610_v62 = vld [vmem:[%s2331_s22 + $0x8] sm:$0xff] }
 0x3cd   : > { %v961_v17 = vmul.f32 1.442695, %v954_v16 }
 0x3cf   : > { %1754 = vpow2.f32 %v961_v17 }
 0x3d0   : > { %v944_v18 = vpop.xlane.xlu1 %943 }
 0x3d1   : > { %v952_v19 = vsub.f32 %v936_v2, %v944_v18  ;;  %v1609_v2 = vld [vmem:[%s2331_s22] sm:$0xff] }
 0x3d3   : > { %v957_v20 = vmul.f32 1.442695, %v952_v19 }
 0x3d5   : > { %v1755_v21 = vpop.eup %1754  ;;  %1756 = vpow2.f32 %v957_v20 }
 0x3d6   : > { %v972_v22 = vsel %vm841_vm6, %v1755_v21, 0.0  ;;  %v978_v27 = vpack.c.bf16 %v1755_v21, %v1755_v21 }
 0x3d7   : > { %973 = vadd.xlane.f32.xlu2 %v972_v22 }
 0x3db   : > { %v1757_v23 = vpop.eup %1756 }
 0x3dc   : > { %v966_v24 = vsel %vm841_vm6, %v1757_v23, 0.0  ;;  %v976_v38 = vpack.c.bf16 %v1757_v23, %v1757_v23 }
 0x3dd   : > { %967 = vadd.xlane.f32.xlu0 %v966_v24  ;;  %v1044_v25 = vpop.permute.xlu0 %1043 }
 0x3de   : > { %v1049_v26 = vsel %vm984_vm8, %v1044_v25, 0  ;;  %v1612_v25 = vld [vmem:[%s2340_s7 + $0x8] sm:$0xff] }
 0x3df   : > { %1058 = vmatpush.bf16.msra.mxu0 %v1049_v26  ;;  %v1611_v26 = vld [vmem:[%s2340_s7] sm:$0xff] }
 0x3e2   : > { %1562 = vmatmul.msk.bf16.vlgmr.msra.gmra.mxu0 %vm841_vm6, %v978_v27  ;;  %v1616_v27 = vld [vmem:[%s2350_s25 + $0x18] sm:$0xff] }
 0x3e8   : > { %v1023_v28 = vpop.permute.xlu1 %1022 }
 0x3e9   : > { %v1028_v29 = vsel %vm984_vm8, %v1023_v28, 0 }
 0x3ea   : > { %1037 = vmatpush.bf16.msrb.mxu3 %v1028_v29  ;;  %v1615_v29 = vld [vmem:[%s2350_s25 + $0x10] sm:$0xff] }
 0x3ee   : > { %1238 = vmatpush.bf16.msra.mxu3 %v1616_v27 }
 0x3f0   : > { %v980_v30 = vpop.permute.xlu1 %979  ;;  %v947_v31 = vpop.xlane.xlu2 %946 }
 0x3f1   : > { %v953_v32 = vsub.f32 %v937_v11, %v947_v31  ;;  %v986_v33 = vsel %vm984_vm8, %v980_v30, 0 }
 0x3f2   : > { %995 = vmatpush.bf16.msrb.mxu1 %v986_v33  ;;  %1239 = vmatpush.bf16.msra.mxu3 %v1615_v29 }
 0x3f3   : > { %v959_v34 = vmul.f32 1.442695, %v953_v32 }
 0x3f5   : > { %1758 = vpow2.f32 %v959_v34 }
 0x3f6   : > { %1119 = vmatpush.bf16.msra.mxu1 %v1610_v62 }
 0x3f8   : > { %v1002_v35 = vpop.permute.xlu2 %1001 }
 0x3f9   : > { %v1007_v36 = vsel %vm984_vm8, %v1002_v35, 0 }
 0x3fa   : > { %1016 = vmatpush.bf16.msrb.mxu2 %v1007_v36  ;;  %1120 = vmatpush.bf16.msra.mxu1 %v1609_v2 }
 0x3fb   : > { %v1759_v37 = vpop.eup %1758 }
 0x3fc   : > { %v969_v39 = vsel %vm841_vm6, %v1759_v37, 0.0  ;;  %v977_v40 = vpack.c.bf16 %v1759_v37, %v1759_v37  ;;  %v1746_v37 = vld [vmem:[%s718_s10] ss:$0 sm:$0xff] }
 0x3fd   : > { %970 = vadd.xlane.f32.xlu1 %v969_v39  ;;  %1560 = vmatmul.msk.bf16.vlgmr.msrb.gmra.mxu2 %vm841_vm6, %v976_v38 }
 0x3fe   : > { %1561 = vmatmul.msk.bf16.vlgmr.msrb.gmra.mxu3 %vm841_vm6, %v977_v40  ;;  %1189 = vmatpush.bf16.msra.mxu2 %v1612_v25  ;;  %v1747_v40 = vld [vmem:[%s2587_s8] ss:$0 sm:$0xff] }
 0x402   : > { %1190 = vmatpush.bf16.msra.mxu2 %v1611_v26 }
 0x431   : > { %v941_v41 = vpop.xlane.xlu2 %940 }
 0x432   : > { %v951_v42 = vsub.f32 %v935_v6, %v941_v41 }
 0x434   : > { %v955_v43 = vmul.f32 1.442695, %v951_v42 }
 0x436   : > { %1760 = vpow2.f32 %v955_v43 }
 0x43c   : > { %v1761_v44 = vpop.eup %1760 }
 0x43d   : > { %v963_v45 = vsel %vm841_vm6, %v1761_v44, 0.0  ;;  %v975_v46 = vpack.c.bf16 %v1761_v44, %v1761_v44  ;;  %v1614_v44 = vld [vmem:[%s2350_s25 + $0x8] sm:$0xff] }
 0x43e   : > { %964 = vadd.xlane.f32.xlu2 %v963_v45  ;;  %1240 = vmatpush.bf16.msra.mxu3 %v1614_v44  ;;  %v1613_v45 = vld [vmem:[%s2350_s25] sm:$0xff] }
 0x43f   : > { %1559 = vmatmul.msk.bf16.vlgmr.msrb.gmra.mxu1 %vm841_vm6, %v975_v46  ;;  %v1748_v46 = vld [vmem:[%s726_s14] ss:$0 sm:$0xff]  ;;  %s2590_s14 = sld [smem:[#allocation41_spill]] (!%p1598_p9) }
 0x442   : > { %1241 = vmatpush.bf16.msra.mxu3 %v1613_v45 }
 0x44a   : > { %v974_v47 = vpop.xlane.xlu2 %973 }
 0x44b   : > { %1762 = vrcp.f32 %v974_v47 }
 0x450   : > { %v968_v52 = vpop.xlane.xlu0 %967 }
 0x451   : > { %v1763_v48 = vpop.eup %1762  ;;  %1764 = vrcp.f32 %v968_v52  ;;  %v1749_v52 = vld [vmem:[%s734_s0] ss:$0 sm:$0xff] }
 0x457   : > { %v1765_v54 = vpop.eup %1764 }
 0x45f   : > { %v1060_v49 = vpop.f32.mrf.mxu0 }
 0x460   : > { %v1071_v50 = vmul.f32 %v1763_v48, %v1060_v49 }
 0x462   : > { %1081 = vrot.lane.b32.xlu2 %v1071_v50, %s2034_s24 }
 0x467   : > { %v1062_v51 = vpop.f32.mrf.mxu0 }
 0x470   : > { %v971_v53 = vpop.xlane.xlu1 %970 }
 0x471   : > { %1766 = vrcp.f32 %v971_v53 }
 0x477   : > { %v1767_v56 = vpop.eup %1766 }
 0x480   : > { %v1018_v55 = vpop.f32.mrf.mxu2 }
 0x481   : > { %v1069_v57 = vmul.f32 %v1765_v54, %v1018_v55  ;;  %v1039_v58 = vpop.f32.mrf.mxu3 }
 0x482   : > { %v1070_v59 = vmul.f32 %v1767_v56, %v1039_v58 }
 0x483   : > { %1073 = vrot.lane.b32.xlu0 %v1069_v57, %s2035_s1 }
 0x484   : > { %1077 = vrot.lane.b32.xlu1 %v1070_v59, %s2036_s6 }
 0x488   : > { %v1020_v60 = vpop.f32.mrf.mxu2 }
 0x489   : > { %v1041_v61 = vpop.f32.mrf.mxu3 }
 0x4b1   : > { %v965_v3 = vpop.xlane.xlu2 %964 }
 0x4b2   : > { %1768 = vrcp.f32 %v965_v3 }
 0x4b8   : > { %v1769_v4 = vpop.eup %1768 }
 0x4bc   : > { %v997_v63 = vpop.f32.mrf.mxu1  ;;  %v1082_v10 = vpop.permute.xlu2 %1081 }
 0x4bd   : > { %v1068_v5 = vmul.f32 %v1769_v4, %v997_v63 }
 0x4c4   : > { %v999_v0 = vpop.f32.mrf.mxu1 }
 0x4f5   : > { %v1074_v6 = vpop.permute.xlu0 %1073 }
 0x4f6   : > { %v1084_v7 = vsel %vm841_vm6, %v1068_v5, %v1074_v6  ;;  %v1078_v8 = vpop.permute.xlu1 %1077 }
 0x4f7   : > { %v1086_v11 = vsel %vm1085_vm9, %v1084_v7, %v1078_v8 }
 0x4f8   : > { %v1088_v12 = vsel %vm1087_vm10, %v1086_v11, %v1082_v10 }
 0x4f9   : > { %v1089_v13 = vpack.c.bf16 %v1088_v12, %v1088_v12 }
 0x4fb   : > { %1571 = vmatmul.msk.bf16.vlgmr.msra.gmra.mxu1 %vm746_vm1, %v1089_v13 }
 0x578   : > { %v1122_v15 = vpop.f32.mrf.mxu1 }
 0x579   : > { %v1123_v16 = vadd.f32 %v1745_v14, %v1122_v15 }
 0x57b   : > { %v1126_v17 = vadd.f32 %v1123_v16, %v2359_v1 }
 0x57d   : > { %v1129_v18 = vsel %vm746_vm1, %v1126_v17, 0.0 }
 0x57e   : > { %1130 = vadd.xlane.f32.xlu0 %v1129_v18 }
 0x580   : > { %v1124_v19 = vpop.f32.mrf.mxu1 }
 0x5f1   : > { %v1131_v20 = vpop.xlane.xlu0 %1130 }
 0x5f2   : > { %v1132_v21 = vmul.f32 %v1131_v20, %v2363_v9 }
 0x5f4   : > { %v1133_v22 = vsub.f32 %v1126_v17, %v1132_v21 }
 0x5f6   : > { %v1134_v23 = vmul.f32 %v1133_v22, %v1133_v22 }
 0x5f8   : > { %v1135_v24 = vsel %vm746_vm1, %v1134_v23, 0.0 }
 0x5f9   : > { %1136 = vadd.xlane.f32.xlu1 %v1135_v24 }
 0x66c   : > { %v1137_v1 = vpop.xlane.xlu1 %1136 }
 0x66d   : > { %v1138_v28 = vmul.f32 %v1137_v1, %v2363_v9 }
 0x66f   : > { %v1139_v30 = vadd.f32 1e-05, %v1138_v28 }
 0x671   : > { %1770 = vrsqrt.f32 %v1139_v30  ;;  %vm1146_vm12 = vweird.f32 %v1139_v30 }
 0x677   : > { %v1771_v31 = vpop.eup %1770 }
 0x678   : > { %v1141_v32 = vmul.f32 %v1771_v31, %v1139_v30  ;;  %vm1147_vm11 = vweird.f32 %v1771_v31 }
 0x679   : > { %vm1148_vm13 = vmor %vm1146_vm12, %vm1147_vm11 }
 0x67a   : > { %v1142_v33 = vmul.f32 %v1771_v31, %v1141_v32 }
 0x67c   : > { %v1143_v34 = vmul.f32 0.5, %v1142_v33 }
 0x67e   : > { %v1144_v35 = vsub.f32 1.5, %v1143_v34 }
 0x680   : > { %v1145_v36 = vmul.f32 %v1771_v31, %v1144_v35 }
 0x682   : > { %v1149_v38 = vsel %vm1148_vm13, %v1771_v31, %v1145_v36 }
 0x683   : > { %v1150_v39 = vmul.f32 %v1149_v38, %v1133_v22 }
 0x685   : > { %v1154_v41 = vmul.f32 %v1746_v37, %v1150_v39 }
 0x687   : > { %v1158_v42 = vadd.f32 %v1747_v40, %v1154_v41 }
 0x689   : > { %v1159_v43 = vpack.c.bf16 %v1158_v42, %v1158_v42 }
 0x68b   : > { %1580 = vmatmul.msk.bf16.vlgmr.msra.gmra.mxu2 %vm746_vm1, %v1159_v43 }
 0x70e   : > { %v1192_v47 = vpop.f32.mrf.mxu2 }
 0x70f   : > { %v1193_v48 = vadd.f32 %v1748_v46, %v1192_v47 }
 0x711   : > { %v1196_v49 = vmax.f32 %v1193_v48, 0.0 }
 0x713   : > { %v1197_v50 = vpack.c.bf16 %v1196_v49, %v1196_v49 }
 0x715   : > { %1597 = vmatmul.msk.bf16.vlgmr.msra.gmra.mxu3 %vm1230_vm14, %v1197_v50 }
 0x716   : > { %v1194_v51 = vpop.f32.mrf.mxu2 }
 0x798   : > { %v1243_v53 = vpop.f32.mrf.mxu3 }
 0x799   : > { %v1247_v54 = vadd.f32 %v1243_v53, %v1126_v17 }
 0x79b   : > { %v1252_v55 = vadd.f32 %v1749_v52, %v1247_v54 }
 0x79c   : > { %1257 = sbr.rel (%p1598_p9) target bundleno = 2224 (0x8b0), region = 100 }
 0x79d   : > { %1253 = vst.msk [vmem:[#allocation2] sm:$0xff] %vm746_vm1, %v1252_v55 }
 0x7a0   : > { %v1245_v56 = vpop.f32.mrf.mxu3 }
 0x7a1   : > { %v1260_v57 = vsel %vm746_vm1, %v1252_v55, 0.0  ;;  %v1772_v10 = vld [vmem:[%s2590_s14] ss:$0 sm:$0xff] }
 0x7a2   : > { %1261 = vadd.xlane.f32.xlu0 %v1260_v57 }
 0x815   : > { %v1262_v58 = vpop.xlane.xlu0 %1261 }
 0x816   : > { %v1263_v59 = vmul.f32 %v1262_v58, %v2363_v9 }
 0x818   : > { %v1264_v60 = vsub.f32 %v1252_v55, %v1263_v59 }
 0x81a   : > { %v1265_v61 = vmul.f32 %v1264_v60, %v1264_v60 }
 0x81c   : > { %v1266_v62 = vsel %vm746_vm1, %v1265_v61, 0.0  ;;  %vm1291_vm1 = vcmask 257024  }
 0x81d   : > { %1267 = vadd.xlane.f32.xlu0 %v1266_v62 }
 0x890   : > { %v1268_v63 = vpop.xlane.xlu0 %1267 }
 0x891   : > { %v1269_v0 = vmul.f32 %v1268_v63, %v2363_v9  ;;  %v1773_v9 = vld [vmem:[%s2591_s30] ss:$0 sm:$0xff] }
 0x893   : > { %v1270_v2 = vadd.f32 1e-05, %v1269_v0 }
 0x895   : > { %1774 = vrsqrt.f32 %v1270_v2  ;;  %vm1277_vm0 = vweird.f32 %v1270_v2 }
 0x89b   : > { %v1775_v3 = vpop.eup %1774 }
 0x89c   : > { %v1272_v4 = vmul.f32 %v1775_v3, %v1270_v2  ;;  %vm1278_vm15 = vweird.f32 %v1775_v3 }
 0x89d   : > { %vm1279_vm2 = vmor %vm1277_vm0, %vm1278_vm15 }
 0x89e   : > { %v1273_v5 = vmul.f32 %v1775_v3, %v1272_v4 }
 0x8a0   : > { %v1274_v6 = vmul.f32 0.5, %v1273_v5 }
 0x8a2   : > { %v1275_v7 = vsub.f32 1.5, %v1274_v6 }
 0x8a4   : > { %v1276_v8 = vmul.f32 %v1775_v3, %v1275_v7 }
 0x8a6   : > { %v1280_v11 = vsel %vm1279_vm2, %v1775_v3, %v1276_v8 }
 0x8a7   : > { %v1281_v12 = vmul.f32 %v1280_v11, %v1264_v60 }
 0x8a9   : > { %v1285_v13 = vmul.f32 %v1772_v10, %v1281_v12 }
 0x8ab   : > { %v1289_v14 = vadd.f32 %v1773_v9, %v1285_v13 }
 0x8ad   : > { %v1290_v15 = vpack.c.bf16 %v1289_v14, %v1289_v14 }
 0x8af   : > { %1292 = vst.msk [vmem:[%s2356_s20] sm:$0xf] %vm1291_vm1, %v1290_v15 }
 0x8b0 PF: > { %s2592_s17 = sld [smem:[#allocation21_spill]]  ;;  %s1306_s6 = sshll.u32 %s2356_s20, 4  ;;  %s1307_s6 = int_to_ptr.vmem [resolvable:$true] %s1306_s6 }
 0x8b1   : > { %s2594_s24 = sld [smem:[#allocation43_spill]]  ;;  %s1294_s22 = scalar_lea.sflag [#allocation5], %s2289_s15 }
 0x8b6   : > { %s1600_s12 = sshll.u32 %s2592_s17, 2 }
 0x8b7   : > { %s1304_s1 = scalar_lea.hbm %s2594_s24, %s1600_s12  ;;  %s1916_s8 = scalar_lea.hbm %s2594_s24, 8 }
 0x8b8   : > { %s1308_s13 = sshll.u32 %s1304_s1, 4  ;;  %s1309_s13 = int_to_ptr.hbm [resolvable:$true] %s1308_s13 }
 0x8b9   : > { %s1910_s28 = sshra.s32 %s1309_s13, 4  ;;  %s1911_s28 = int_to_ptr.hbm [resolvable:$true] %s1910_s28 }
 0x8ba   : > { %s1912_s7 = scalar_lea.hbm %s1911_s28, 4  ;;  %p1917_p5 = scmp.lt.s32.totalorder %s1911_s28, %s2594_s24 }
 0x8bb   : > { %p1913_p12 = scmp.ne.s32.totalorder %s1911_s28, %s1912_s7  ;;  %p1918_p6 = scmp.lt.s32.totalorder %s1916_s8, %s1912_s7 }
 0x8bd   : > { %p1914_p13 = pnand %p1913_p12, %p2248_p0  ;;  %p1919_p10 = por %p1918_p6, %p1917_p5 }
 0x8bf   : > { %p1915_p4 = pneg %p1914_p13 }
 0x8c1   : > { %p1920_p1 = pnand %p1919_p10, %p1915_p4 }
 0x8c3   : > { %1923 = shalt.err (!%p1920_p1)
}
 0x8c4   : > { %1625 = dma.vmem_to_hbm [thread:$0]  (%p2248_p0), %s1307_s6, 64, %s1309_s13, %s1294_s22  }
 0x8c5 PF: > { %s2595_s15 = sld [smem:[#allocation18_spill]]  ;;  %p1645_p11 = scmp.ge.s32.totalorder %s2026_s23, 2 }
 0x8c7   : > { %p1641_p2 = pnand %p1645_p11, %p2255_p3 }
 0x8c9   : > { %p1642_p8 = pneg %p1641_p2 }
 0x8cb   : > { %s1320_s18 = sand.u32 1, %s2595_s15  }
 0x8cc   : > { %s1321_s16 = scalar_lea.sflag [#allocation5], %s1320_s18 }
 0x8cd   : > { %1981 = dma.done.wait (%p1642_p8), %s1321_s16, 64  }
 0x8ce   : > { %1983 = vsyncadd (%p1642_p8), %s1321_s16, 4294967232  ;;  %s36_s23 = sadd.s32 1, %s2026_s23   ;;  %s2597_s29 = sld [smem:[#allocation16_spill]] }
 0x8cf   : > { %p33_p7 = scmp.ge.s32.totalorder %s36_s23, 6   ;;  %s2598_s30 = sld [smem:[#allocation17_spill]] }
 0x8d0   : > { %s2599_s15 = sld [smem:[#allocation25_spill]] }
 0x8d1   : > { %s2600_s16 = sld [smem:[#allocation19_spill]] }
 0x8d2   : > { %s2601_s17 = sld [smem:[#allocation20_spill]] }
 0x8d3   : > { %s2602_s18 = sld [smem:[#allocation29_spill]]  ;;  %35 = sbr.rel (!%p33_p7) target bundleno = 28 (0x1c), region = 190 }
 0x8d4   : > { %s2603_s19 = sld [smem:[#allocation22_spill]] }
 0x8d5   : > { %s2604_s20 = sld [smem:[#allocation23_spill]] }
 0x8d6   : > { %s2605_s21 = sld [smem:[#allocation24_spill]] }
 0x8d7   : > { %s2606_s22 = sld [smem:[#allocation26_spill]] }
 0x8d8   :  { %1327 = vsyncpa [#allocation4], 1 }
 0x8d9   :  { %1329 = vsyncpa [#allocation4 + $0x1], 1 }
 0x8da   :  { %1330 = vsyncpa [#allocation7], 1 }
 0x8db   :  { %1332 = vsyncpa [#allocation7 + $0x1], 1 }
 0x8dc   :  { %1333 = vsyncpa [#allocation10], 1 }
 0x8dd   :  { %1335 = vsyncpa [#allocation10 + $0x1], 1 }
 0x8de   :  { %1336 = vsyncpa [#allocation5], 1 }
 0x8df   :  { %1338 = vsyncpa [#allocation5 + $0x1], 1 }

</bundles_post_ra>
